<compile_context>
chip_gen: v6e
topology: v6e:2x2x1
jax: 0.10.0
libtpu: 0.0.40
codegen_flags: <defaults>
</compile_context>

<pallas_src>
import functools

import jax
import jax.numpy as jnp
from jax.experimental import pallas as pl
from jax.experimental.pallas import tpu as pltpu


# ----------------------------------------------------------------------------
# Fused kernel: depth LSTM layers + FC + Sigmoid, single invocation (no grid).
# PyTorch gate ordering along the 4*H axis: [i, f, g, o].
#
# Ref order: x_flat, (w_ih, w_hh, b) * depth, fc_w, fc_b   -> inputs
#            out                                           -> output
#            y_scr (T*B, H)                                -> VMEM scratch
# ----------------------------------------------------------------------------
def _fused_discriminator_kernel(*refs, T, B, H, depth):
    n_in = 1 + 3 * depth + 2
    x_ref = refs[0]
    lstm_refs = refs[1:1 + 3 * depth]
    fc_w_ref = refs[1 + 3 * depth]
    fc_b_ref = refs[2 + 3 * depth]
    o_ref = refs[n_in]
    y_scr = refs[n_in + 1]

    def lstm_layer(x_flat, w_ih_ref, w_hh_ref, b_ref, store_all):
        # Hoisted input projection: ONE matmul covering every timestep.
        w_hh = w_hh_ref[...]                                      # (H, 4H)
        gates_in = (jnp.dot(x_flat, w_ih_ref[...],
                            preferred_element_type=jnp.float32)
                    + b_ref[...])                                 # (T*B, 4H)

        h = jnp.zeros((B, H), jnp.float32)
        c = jnp.zeros((B, H), jnp.float32)

        # Serial recurrence, fully unrolled (T is small & static).
        for t in range(T):
            g = gates_in[t * B:(t + 1) * B, :] + jnp.dot(
                h, w_hh, preferred_element_type=jnp.float32)      # (B, 4H)
            # Full-vreg EUP ops, then extract gate bands.
            sg = jax.nn.sigmoid(g)
            th = jnp.tanh(g)
            i_g = sg[:, 0 * H:1 * H]
            f_g = sg[:, 1 * H:2 * H]
            g_g = th[:, 2 * H:3 * H]
            o_g = sg[:, 3 * H:4 * H]
            c = f_g * c + i_g * g_g
            h = o_g * jnp.tanh(c)
            if store_all:
                y_scr[t * B:(t + 1) * B, :] = h   # layer output for next layer
        return h

    # Layer 0 reads the flattened input; layers 1..depth-1 read the scratch.
    x_flat = x_ref[...]
    for layer in range(depth):
        w_ih_ref = lstm_refs[3 * layer + 0]
        w_hh_ref = lstm_refs[3 * layer + 1]
        b_ref = lstm_refs[3 * layer + 2]
        need_all = layer < depth - 1
        h_last = lstm_layer(x_flat, w_ih_ref, w_hh_ref, b_ref, need_all)
        if need_all:
            x_flat = y_scr[...]

    # FC + Sigmoid head on the last timestep of the last layer (output[:, -1]).
    o_ref[...] = jax.nn.sigmoid(
        jnp.dot(h_last, fc_w_ref[...], preferred_element_type=jnp.float32)
        + fc_b_ref[...]).astype(o_ref.dtype)


def discriminator_lstm_forward(x_bti, params):
    """x_bti: (B, T, input_size) as in PyTorch batch_first. Returns (B, output_size)."""
    B, T, I = x_bti.shape
    depth = len(params["lstm"])
    H = params["lstm"][0][1].shape[0]
    O = params["fc_w"].shape[1]

    # time-major flattened: row index = t*B + b
    x_flat = jnp.transpose(x_bti, (1, 0, 2)).reshape(T * B, I)

    flat_weights = []
    for (w_ih, w_hh, b) in params["lstm"]:
        flat_weights += [w_ih, w_hh, b]

    kernel = functools.partial(_fused_discriminator_kernel,
                               T=T, B=B, H=H, depth=depth)
    return pl.pallas_call(
        kernel,
        out_shape=jax.ShapeDtypeStruct((B, O), jnp.float32),
        scratch_shapes=[pltpu.VMEM((T * B, H), jnp.float32)],  # per-layer activations
    )(x_flat, *flat_weights, params["fc_w"], params["fc_b"])


# ----------------------------------------------------------------------------
# Deterministic parameter initialization (shapes match nn.LSTM / nn.Linear).
# ----------------------------------------------------------------------------
def init_params(key, input_size, hidden, output_size, depth):
    k = 1.0 / jnp.sqrt(hidden)
    lstm_params = []
    for layer in range(depth):
        in_sz = input_size if layer == 0 else hidden
        key, k1, k2, k3, k4 = jax.random.split(key, 5)
        # PyTorch stores weight_ih as (4H, in); we store transposed (in, 4H).
        w_ih = jax.random.uniform(k1, (in_sz, 4 * hidden), jnp.float32, -k, k)
        w_hh = jax.random.uniform(k2, (hidden, 4 * hidden), jnp.float32, -k, k)
        b_ih = jax.random.uniform(k3, (4 * hidden,), jnp.float32, -k, k)
        b_hh = jax.random.uniform(k4, (4 * hidden,), jnp.float32, -k, k)
        b = (b_ih + b_hh)[None, :]                  # (1, 4H)
        lstm_params.append((w_ih, w_hh, b))
    key, k5, k6 = jax.random.split(key, 3)
    kf = 1.0 / jnp.sqrt(hidden)
    fc_w = jax.random.uniform(k5, (hidden, output_size), jnp.float32, -kf, kf)
    fc_b = jax.random.uniform(k6, (1, output_size), jnp.float32, -kf, kf)
    return {"lstm": lstm_params, "fc_w": fc_w, "fc_b": fc_b}


# ----------------------------------------------------------------------------
# Pure-JAX reference (for correctness check).
# ----------------------------------------------------------------------------
def _lstm_layer_ref(x_tbi, w_ih, w_hh, b):
    T, B, _ = x_tbi.shape
    H = w_hh.shape[0]

    def step(carry, x_t):
        h, c = carry
        gates = x_t @ w_ih + h @ w_hh + b
        i = jax.nn.sigmoid(gates[:, 0 * H:1 * H])
        f = jax.nn.sigmoid(gates[:, 1 * H:2 * H])
        g = jnp.tanh(gates[:, 2 * H:3 * H])
        o = jax.nn.sigmoid(gates[:, 3 * H:4 * H])
        c_new = f * c + i * g
        h_new = o * jnp.tanh(c_new)
        return (h_new, c_new), h_new

    init = (jnp.zeros((B, H), jnp.float32), jnp.zeros((B, H), jnp.float32))
    _, ys = jax.lax.scan(step, init, x_tbi)
    return ys


def discriminator_lstm_ref(x_bti, params):
    x = jnp.transpose(x_bti, (1, 0, 2))
    for (w_ih, w_hh, b) in params["lstm"]:
        x = _lstm_layer_ref(x, w_ih, w_hh, b)
    h_last = x[-1]
    return jax.nn.sigmoid(h_last @ params["fc_w"] + params["fc_b"])


# ----------------------------------------------------------------------------
if __name__ == "__main__":
    B, T = 2, 8
    input_size, hidden, output_size, depth = 16, 32, 1, 3

    key = jax.random.PRNGKey(0)
    key, kx, kp = jax.random.split(key, 3)
    x = jax.random.normal(kx, (B, T, input_size), jnp.float32)
    params = init_params(kp, input_size, hidden, output_size, depth)

    out = discriminator_lstm_forward(x, params)
    out = jax.block_until_ready(out)

    ref = discriminator_lstm_ref(x, params)
    assert out.shape == (B, output_size)
    assert jnp.allclose(out, ref, atol=1e-5, rtol=1e-5), (out, ref)

    print("KERNEL_OK")
</pallas_src>

<mosaic_0001>
module attributes {stable_mosaic.version = 11 : i64} {
  func.func @_fused_discriminator_kernel(%arg0: memref<16x16xf32, #tpu.memory_space<vmem>>, %arg1: memref<16x128xf32, #tpu.memory_space<vmem>>, %arg2: memref<32x128xf32, #tpu.memory_space<vmem>>, %arg3: memref<1x128xf32, #tpu.memory_space<vmem>>, %arg4: memref<32x128xf32, #tpu.memory_space<vmem>>, %arg5: memref<32x128xf32, #tpu.memory_space<vmem>>, %arg6: memref<1x128xf32, #tpu.memory_space<vmem>>, %arg7: memref<32x128xf32, #tpu.memory_space<vmem>>, %arg8: memref<32x128xf32, #tpu.memory_space<vmem>>, %arg9: memref<1x128xf32, #tpu.memory_space<vmem>>, %arg10: memref<32x1xf32, #tpu.memory_space<vmem>>, %arg11: memref<1x1xf32, #tpu.memory_space<vmem>>, %arg12: memref<2x1xf32, #tpu.memory_space<vmem>>, %arg13: memref<16x32xf32, #tpu.memory_space<vmem>>) attributes {dimension_semantics = [], scalar_prefetch = 0 : i64, scratch_operands = 1 : i64, tpu.core_type = #tpu.core_type<tc>} {
    %c0 = arith.constant 0 : index
    %c0_0 = arith.constant 0 : index
    %0 = vector.load %arg0[%c0, %c0_0] : memref<16x16xf32, #tpu.memory_space<vmem>>, vector<16x16xf32>
    %c0_1 = arith.constant 0 : index
    %c0_2 = arith.constant 0 : index
    %1 = vector.load %arg2[%c0_1, %c0_2] : memref<32x128xf32, #tpu.memory_space<vmem>>, vector<32x128xf32>
    %c0_3 = arith.constant 0 : index
    %c0_4 = arith.constant 0 : index
    %2 = vector.load %arg1[%c0_3, %c0_4] : memref<16x128xf32, #tpu.memory_space<vmem>>, vector<16x128xf32>
    %cst = arith.constant dense<0.000000e+00> : vector<16x128xf32>
    %3 = tpu.matmul %0, %2, %cst {dimension_numbers = #tpu.dot_dimension_numbers<[1], [0], [0], [1], [0, 0, 1, 1], [], []>} : vector<16x16xf32>, vector<16x128xf32>, vector<16x128xf32> -> vector<16x128xf32>
    %c0_5 = arith.constant 0 : index
    %c0_6 = arith.constant 0 : index
    %4 = vector.load %arg3[%c0_5, %c0_6] : memref<1x128xf32, #tpu.memory_space<vmem>>, vector<1x128xf32>
    %5 = vector.broadcast %4 : vector<1x128xf32> to vector<16x128xf32>
    %6 = arith.addf %3, %5 : vector<16x128xf32>
    %cst_7 = arith.constant 0.000000e+00 : f32
    %7 = vector.broadcast %cst_7 : f32 to vector<2x32xf32>
    %cst_8 = arith.constant 0.000000e+00 : f32
    %8 = vector.broadcast %cst_8 : f32 to vector<2x32xf32>
    %9 = vector.extract_strided_slice %6 {offsets = [0, 0], sizes = [2, 128], strides = [1, 1]} : vector<16x128xf32> to vector<2x128xf32>
    %cst_9 = arith.constant dense<0.000000e+00> : vector<2x128xf32>
    %10 = tpu.matmul %7, %1, %cst_9 {dimension_numbers = #tpu.dot_dimension_numbers<[1], [0], [0], [1], [0, 0, 1, 1], [], []>} : vector<2x32xf32>, vector<32x128xf32>, vector<2x128xf32> -> vector<2x128xf32>
    %11 = arith.addf %9, %10 : vector<2x128xf32>
    %12 = arith.negf %11 : vector<2x128xf32>
    %13 = math.exp %12 : vector<2x128xf32>
    %cst_10 = arith.constant 1.000000e+00 : f32
    %14 = vector.broadcast %cst_10 : f32 to vector<2x128xf32>
    %15 = arith.addf %14, %13 : vector<2x128xf32>
    %16 = arith.divf %14, %15 : vector<2x128xf32>
    %17 = math.tanh %11 : vector<2x128xf32>
    %18 = vector.extract_strided_slice %16 {offsets = [0, 0], sizes = [2, 32], strides = [1, 1]} : vector<2x128xf32> to vector<2x32xf32>
    %19 = vector.extract_strided_slice %16 {offsets = [0, 32], sizes = [2, 32], strides = [1, 1]} : vector<2x128xf32> to vector<2x32xf32>
    %20 = vector.extract_strided_slice %17 {offsets = [0, 64], sizes = [2, 32], strides = [1, 1]} : vector<2x128xf32> to vector<2x32xf32>
    %21 = vector.extract_strided_slice %16 {offsets = [0, 96], sizes = [2, 32], strides = [1, 1]} : vector<2x128xf32> to vector<2x32xf32>
    %22 = arith.mulf %19, %8 : vector<2x32xf32>
    %23 = arith.mulf %18, %20 : vector<2x32xf32>
    %24 = arith.addf %22, %23 : vector<2x32xf32>
    %25 = math.tanh %24 : vector<2x32xf32>
    %26 = arith.mulf %21, %25 : vector<2x32xf32>
    %c0_11 = arith.constant 0 : index
    %c0_12 = arith.constant 0 : index
    %27 = vector.load %arg13[%c0_11, %c0_12] : memref<16x32xf32, #tpu.memory_space<vmem>>, vector<2x32xf32>
    tpu.vector_store %arg13[%c0_11, %c0_12], %26 {strides = array<i32>} : memref<16x32xf32, #tpu.memory_space<vmem>>, vector<2x32xf32>,
    %28 = vector.extract_strided_slice %6 {offsets = [2, 0], sizes = [2, 128], strides = [1, 1]} : vector<16x128xf32> to vector<2x128xf32>
    %cst_13 = arith.constant dense<0.000000e+00> : vector<2x128xf32>
    %29 = tpu.matmul %26, %1, %cst_13 {dimension_numbers = #tpu.dot_dimension_numbers<[1], [0], [0], [1], [0, 0, 1, 1], [], []>} : vector<2x32xf32>, vector<32x128xf32>, vector<2x128xf32> -> vector<2x128xf32>
    %30 = arith.addf %28, %29 : vector<2x128xf32>
    %31 = arith.negf %30 : vector<2x128xf32>
    %32 = math.exp %31 : vector<2x128xf32>
    %cst_14 = arith.constant 1.000000e+00 : f32
    %33 = vector.broadcast %cst_14 : f32 to vector<2x128xf32>
    %34 = arith.addf %33, %32 : vector<2x128xf32>
    %35 = arith.divf %33, %34 : vector<2x128xf32>
    %36 = math.tanh %30 : vector<2x128xf32>
    %37 = vector.extract_strided_slice %35 {offsets = [0, 0], sizes = [2, 32], strides = [1, 1]} : vector<2x128xf32> to vector<2x32xf32>
    %38 = vector.extract_strided_slice %35 {offsets = [0, 32], sizes = [2, 32], strides = [1, 1]} : vector<2x128xf32> to vector<2x32xf32>
    %39 = vector.extract_strided_slice %36 {offsets = [0, 64], sizes = [2, 32], strides = [1, 1]} : vector<2x128xf32> to vector<2x32xf32>
    %40 = vector.extract_strided_slice %35 {offsets = [0, 96], sizes = [2, 32], strides = [1, 1]} : vector<2x128xf32> to vector<2x32xf32>
    %41 = arith.mulf %38, %24 : vector<2x32xf32>
    %42 = arith.mulf %37, %39 : vector<2x32xf32>
    %43 = arith.addf %41, %42 : vector<2x32xf32>
    %44 = math.tanh %43 : vector<2x32xf32>
    %45 = arith.mulf %40, %44 : vector<2x32xf32>
    %c2 = arith.constant 2 : index
    %c0_15 = arith.constant 0 : index
    %46 = vector.load %arg13[%c2, %c0_15] : memref<16x32xf32, #tpu.memory_space<vmem>>, vector<2x32xf32>
    tpu.vector_store %arg13[%c2, %c0_15], %45 {strides = array<i32>} : memref<16x32xf32, #tpu.memory_space<vmem>>, vector<2x32xf32>,
    %47 = vector.extract_strided_slice %6 {offsets = [4, 0], sizes = [2, 128], strides = [1, 1]} : vector<16x128xf32> to vector<2x128xf32>
    %cst_16 = arith.constant dense<0.000000e+00> : vector<2x128xf32>
    %48 = tpu.matmul %45, %1, %cst_16 {dimension_numbers = #tpu.dot_dimension_numbers<[1], [0], [0], [1], [0, 0, 1, 1], [], []>} : vector<2x32xf32>, vector<32x128xf32>, vector<2x128xf32> -> vector<2x128xf32>
    %49 = arith.addf %47, %48 : vector<2x128xf32>
    %50 = arith.negf %49 : vector<2x128xf32>
    %51 = math.exp %50 : vector<2x128xf32>
    %cst_17 = arith.constant 1.000000e+00 : f32
    %52 = vector.broadcast %cst_17 : f32 to vector<2x128xf32>
    %53 = arith.addf %52, %51 : vector<2x128xf32>
    %54 = arith.divf %52, %53 : vector<2x128xf32>
    %55 = math.tanh %49 : vector<2x128xf32>
    %56 = vector.extract_strided_slice %54 {offsets = [0, 0], sizes = [2, 32], strides = [1, 1]} : vector<2x128xf32> to vector<2x32xf32>
    %57 = vector.extract_strided_slice %54 {offsets = [0, 32], sizes = [2, 32], strides = [1, 1]} : vector<2x128xf32> to vector<2x32xf32>
    %58 = vector.extract_strided_slice %55 {offsets = [0, 64], sizes = [2, 32], strides = [1, 1]} : vector<2x128xf32> to vector<2x32xf32>
    %59 = vector.extract_strided_slice %54 {offsets = [0, 96], sizes = [2, 32], strides = [1, 1]} : vector<2x128xf32> to vector<2x32xf32>
    %60 = arith.mulf %57, %43 : vector<2x32xf32>
    %61 = arith.mulf %56, %58 : vector<2x32xf32>
    %62 = arith.addf %60, %61 : vector<2x32xf32>
    %63 = math.tanh %62 : vector<2x32xf32>
    %64 = arith.mulf %59, %63 : vector<2x32xf32>
    %c4 = arith.constant 4 : index
    %c0_18 = arith.constant 0 : index
    %65 = vector.load %arg13[%c4, %c0_18] : memref<16x32xf32, #tpu.memory_space<vmem>>, vector<2x32xf32>
    tpu.vector_store %arg13[%c4, %c0_18], %64 {strides = array<i32>} : memref<16x32xf32, #tpu.memory_space<vmem>>, vector<2x32xf32>,
    %66 = vector.extract_strided_slice %6 {offsets = [6, 0], sizes = [2, 128], strides = [1, 1]} : vector<16x128xf32> to vector<2x128xf32>
    %cst_19 = arith.constant dense<0.000000e+00> : vector<2x128xf32>
    %67 = tpu.matmul %64, %1, %cst_19 {dimension_numbers = #tpu.dot_dimension_numbers<[1], [0], [0], [1], [0, 0, 1, 1], [], []>} : vector<2x32xf32>, vector<32x128xf32>, vector<2x128xf32> -> vector<2x128xf32>
    %68 = arith.addf %66, %67 : vector<2x128xf32>
    %69 = arith.negf %68 : vector<2x128xf32>
    %70 = math.exp %69 : vector<2x128xf32>
    %cst_20 = arith.constant 1.000000e+00 : f32
    %71 = vector.broadcast %cst_20 : f32 to vector<2x128xf32>
    %72 = arith.addf %71, %70 : vector<2x128xf32>
    %73 = arith.divf %71, %72 : vector<2x128xf32>
    %74 = math.tanh %68 : vector<2x128xf32>
    %75 = vector.extract_strided_slice %73 {offsets = [0, 0], sizes = [2, 32], strides = [1, 1]} : vector<2x128xf32> to vector<2x32xf32>
    %76 = vector.extract_strided_slice %73 {offsets = [0, 32], sizes = [2, 32], strides = [1, 1]} : vector<2x128xf32> to vector<2x32xf32>
    %77 = vector.extract_strided_slice %74 {offsets = [0, 64], sizes = [2, 32], strides = [1, 1]} : vector<2x128xf32> to vector<2x32xf32>
    %78 = vector.extract_strided_slice %73 {offsets = [0, 96], sizes = [2, 32], strides = [1, 1]} : vector<2x128xf32> to vector<2x32xf32>
    %79 = arith.mulf %76, %62 : vector<2x32xf32>
    %80 = arith.mulf %75, %77 : vector<2x32xf32>
    %81 = arith.addf %79, %80 : vector<2x32xf32>
    %82 = math.tanh %81 : vector<2x32xf32>
    %83 = arith.mulf %78, %82 : vector<2x32xf32>
    %c6 = arith.constant 6 : index
    %c0_21 = arith.constant 0 : index
    %84 = vector.load %arg13[%c6, %c0_21] : memref<16x32xf32, #tpu.memory_space<vmem>>, vector<2x32xf32>
    tpu.vector_store %arg13[%c6, %c0_21], %83 {strides = array<i32>} : memref<16x32xf32, #tpu.memory_space<vmem>>, vector<2x32xf32>,
    %85 = vector.extract_strided_slice %6 {offsets = [8, 0], sizes = [2, 128], strides = [1, 1]} : vector<16x128xf32> to vector<2x128xf32>
    %cst_22 = arith.constant dense<0.000000e+00> : vector<2x128xf32>
    %86 = tpu.matmul %83, %1, %cst_22 {dimension_numbers = #tpu.dot_dimension_numbers<[1], [0], [0], [1], [0, 0, 1, 1], [], []>} : vector<2x32xf32>, vector<32x128xf32>, vector<2x128xf32> -> vector<2x128xf32>
    %87 = arith.addf %85, %86 : vector<2x128xf32>
    %88 = arith.negf %87 : vector<2x128xf32>
    %89 = math.exp %88 : vector<2x128xf32>
    %cst_23 = arith.constant 1.000000e+00 : f32
    %90 = vector.broadcast %cst_23 : f32 to vector<2x128xf32>
    %91 = arith.addf %90, %89 : vector<2x128xf32>
    %92 = arith.divf %90, %91 : vector<2x128xf32>
    %93 = math.tanh %87 : vector<2x128xf32>
    %94 = vector.extract_strided_slice %92 {offsets = [0, 0], sizes = [2, 32], strides = [1, 1]} : vector<2x128xf32> to vector<2x32xf32>
    %95 = vector.extract_strided_slice %92 {offsets = [0, 32], sizes = [2, 32], strides = [1, 1]} : vector<2x128xf32> to vector<2x32xf32>
    %96 = vector.extract_strided_slice %93 {offsets = [0, 64], sizes = [2, 32], strides = [1, 1]} : vector<2x128xf32> to vector<2x32xf32>
    %97 = vector.extract_strided_slice %92 {offsets = [0, 96], sizes = [2, 32], strides = [1, 1]} : vector<2x128xf32> to vector<2x32xf32>
    %98 = arith.mulf %95, %81 : vector<2x32xf32>
    %99 = arith.mulf %94, %96 : vector<2x32xf32>
    %100 = arith.addf %98, %99 : vector<2x32xf32>
    %101 = math.tanh %100 : vector<2x32xf32>
    %102 = arith.mulf %97, %101 : vector<2x32xf32>
    %c8 = arith.constant 8 : index
    %c0_24 = arith.constant 0 : index
    %103 = vector.load %arg13[%c8, %c0_24] : memref<16x32xf32, #tpu.memory_space<vmem>>, vector<2x32xf32>
    tpu.vector_store %arg13[%c8, %c0_24], %102 {strides = array<i32>} : memref<16x32xf32, #tpu.memory_space<vmem>>, vector<2x32xf32>,
    %104 = vector.extract_strided_slice %6 {offsets = [10, 0], sizes = [2, 128], strides = [1, 1]} : vector<16x128xf32> to vector<2x128xf32>
    %cst_25 = arith.constant dense<0.000000e+00> : vector<2x128xf32>
    %105 = tpu.matmul %102, %1, %cst_25 {dimension_numbers = #tpu.dot_dimension_numbers<[1], [0], [0], [1], [0, 0, 1, 1], [], []>} : vector<2x32xf32>, vector<32x128xf32>, vector<2x128xf32> -> vector<2x128xf32>
    %106 = arith.addf %104, %105 : vector<2x128xf32>
    %107 = arith.negf %106 : vector<2x128xf32>
    %108 = math.exp %107 : vector<2x128xf32>
    %cst_26 = arith.constant 1.000000e+00 : f32
    %109 = vector.broadcast %cst_26 : f32 to vector<2x128xf32>
    %110 = arith.addf %109, %108 : vector<2x128xf32>
    %111 = arith.divf %109, %110 : vector<2x128xf32>
    %112 = math.tanh %106 : vector<2x128xf32>
    %113 = vector.extract_strided_slice %111 {offsets = [0, 0], sizes = [2, 32], strides = [1, 1]} : vector<2x128xf32> to vector<2x32xf32>
    %114 = vector.extract_strided_slice %111 {offsets = [0, 32], sizes = [2, 32], strides = [1, 1]} : vector<2x128xf32> to vector<2x32xf32>
    %115 = vector.extract_strided_slice %112 {offsets = [0, 64], sizes = [2, 32], strides = [1, 1]} : vector<2x128xf32> to vector<2x32xf32>
    %116 = vector.extract_strided_slice %111 {offsets = [0, 96], sizes = [2, 32], strides = [1, 1]} : vector<2x128xf32> to vector<2x32xf32>
    %117 = arith.mulf %114, %100 : vector<2x32xf32>
    %118 = arith.mulf %113, %115 : vector<2x32xf32>
    %119 = arith.addf %117, %118 : vector<2x32xf32>
    %120 = math.tanh %119 : vector<2x32xf32>
    %121 = arith.mulf %116, %120 : vector<2x32xf32>
    %c10 = arith.constant 10 : index
    %c0_27 = arith.constant 0 : index
    %122 = vector.load %arg13[%c10, %c0_27] : memref<16x32xf32, #tpu.memory_space<vmem>>, vector<2x32xf32>
    tpu.vector_store %arg13[%c10, %c0_27], %121 {strides = array<i32>} : memref<16x32xf32, #tpu.memory_space<vmem>>, vector<2x32xf32>,
    %123 = vector.extract_strided_slice %6 {offsets = [12, 0], sizes = [2, 128], strides = [1, 1]} : vector<16x128xf32> to vector<2x128xf32>
    %cst_28 = arith.constant dense<0.000000e+00> : vector<2x128xf32>
    %124 = tpu.matmul %121, %1, %cst_28 {dimension_numbers = #tpu.dot_dimension_numbers<[1], [0], [0], [1], [0, 0, 1, 1], [], []>} : vector<2x32xf32>, vector<32x128xf32>, vector<2x128xf32> -> vector<2x128xf32>
    %125 = arith.addf %123, %124 : vector<2x128xf32>
    %126 = arith.negf %125 : vector<2x128xf32>
    %127 = math.exp %126 : vector<2x128xf32>
    %cst_29 = arith.constant 1.000000e+00 : f32
    %128 = vector.broadcast %cst_29 : f32 to vector<2x128xf32>
    %129 = arith.addf %128, %127 : vector<2x128xf32>
    %130 = arith.divf %128, %129 : vector<2x128xf32>
    %131 = math.tanh %125 : vector<2x128xf32>
    %132 = vector.extract_strided_slice %130 {offsets = [0, 0], sizes = [2, 32], strides = [1, 1]} : vector<2x128xf32> to vector<2x32xf32>
    %133 = vector.extract_strided_slice %130 {offsets = [0, 32], sizes = [2, 32], strides = [1, 1]} : vector<2x128xf32> to vector<2x32xf32>
    %134 = vector.extract_strided_slice %131 {offsets = [0, 64], sizes = [2, 32], strides = [1, 1]} : vector<2x128xf32> to vector<2x32xf32>
    %135 = vector.extract_strided_slice %130 {offsets = [0, 96], sizes = [2, 32], strides = [1, 1]} : vector<2x128xf32> to vector<2x32xf32>
    %136 = arith.mulf %133, %119 : vector<2x32xf32>
    %137 = arith.mulf %132, %134 : vector<2x32xf32>
    %138 = arith.addf %136, %137 : vector<2x32xf32>
    %139 = math.tanh %138 : vector<2x32xf32>
    %140 = arith.mulf %135, %139 : vector<2x32xf32>
    %c12 = arith.constant 12 : index
    %c0_30 = arith.constant 0 : index
    %141 = vector.load %arg13[%c12, %c0_30] : memref<16x32xf32, #tpu.memory_space<vmem>>, vector<2x32xf32>
    tpu.vector_store %arg13[%c12, %c0_30], %140 {strides = array<i32>} : memref<16x32xf32, #tpu.memory_space<vmem>>, vector<2x32xf32>,
    %142 = vector.extract_strided_slice %6 {offsets = [14, 0], sizes = [2, 128], strides = [1, 1]} : vector<16x128xf32> to vector<2x128xf32>
    %cst_31 = arith.constant dense<0.000000e+00> : vector<2x128xf32>
    %143 = tpu.matmul %140, %1, %cst_31 {dimension_numbers = #tpu.dot_dimension_numbers<[1], [0], [0], [1], [0, 0, 1, 1], [], []>} : vector<2x32xf32>, vector<32x128xf32>, vector<2x128xf32> -> vector<2x128xf32>
    %144 = arith.addf %142, %143 : vector<2x128xf32>
    %145 = arith.negf %144 : vector<2x128xf32>
    %146 = math.exp %145 : vector<2x128xf32>
    %cst_32 = arith.constant 1.000000e+00 : f32
    %147 = vector.broadcast %cst_32 : f32 to vector<2x128xf32>
    %148 = arith.addf %147, %146 : vector<2x128xf32>
    %149 = arith.divf %147, %148 : vector<2x128xf32>
    %150 = math.tanh %144 : vector<2x128xf32>
    %151 = vector.extract_strided_slice %149 {offsets = [0, 0], sizes = [2, 32], strides = [1, 1]} : vector<2x128xf32> to vector<2x32xf32>
    %152 = vector.extract_strided_slice %149 {offsets = [0, 32], sizes = [2, 32], strides = [1, 1]} : vector<2x128xf32> to vector<2x32xf32>
    %153 = vector.extract_strided_slice %150 {offsets = [0, 64], sizes = [2, 32], strides = [1, 1]} : vector<2x128xf32> to vector<2x32xf32>
    %154 = vector.extract_strided_slice %149 {offsets = [0, 96], sizes = [2, 32], strides = [1, 1]} : vector<2x128xf32> to vector<2x32xf32>
    %155 = arith.mulf %152, %138 : vector<2x32xf32>
    %156 = arith.mulf %151, %153 : vector<2x32xf32>
    %157 = arith.addf %155, %156 : vector<2x32xf32>
    %158 = math.tanh %157 : vector<2x32xf32>
    %159 = arith.mulf %154, %158 : vector<2x32xf32>
    %c14 = arith.constant 14 : index
    %c0_33 = arith.constant 0 : index
    %160 = vector.load %arg13[%c14, %c0_33] : memref<16x32xf32, #tpu.memory_space<vmem>>, vector<2x32xf32>
    tpu.vector_store %arg13[%c14, %c0_33], %159 {strides = array<i32>} : memref<16x32xf32, #tpu.memory_space<vmem>>, vector<2x32xf32>,
    %c0_34 = arith.constant 0 : index
    %c0_35 = arith.constant 0 : index
    %161 = vector.load %arg13[%c0_34, %c0_35] : memref<16x32xf32, #tpu.memory_space<vmem>>, vector<16x32xf32>
    %c0_36 = arith.constant 0 : index
    %c0_37 = arith.constant 0 : index
    %162 = vector.load %arg5[%c0_36, %c0_37] : memref<32x128xf32, #tpu.memory_space<vmem>>, vector<32x128xf32>
    %c0_38 = arith.constant 0 : index
    %c0_39 = arith.constant 0 : index
    %163 = vector.load %arg4[%c0_38, %c0_39] : memref<32x128xf32, #tpu.memory_space<vmem>>, vector<32x128xf32>
    %cst_40 = arith.constant dense<0.000000e+00> : vector<16x128xf32>
    %164 = tpu.matmul %161, %163, %cst_40 {dimension_numbers = #tpu.dot_dimension_numbers<[1], [0], [0], [1], [0, 0, 1, 1], [], []>} : vector<16x32xf32>, vector<32x128xf32>, vector<16x128xf32> -> vector<16x128xf32>
    %c0_41 = arith.constant 0 : index
    %c0_42 = arith.constant 0 : index
    %165 = vector.load %arg6[%c0_41, %c0_42] : memref<1x128xf32, #tpu.memory_space<vmem>>, vector<1x128xf32>
    %166 = vector.broadcast %165 : vector<1x128xf32> to vector<16x128xf32>
    %167 = arith.addf %164, %166 : vector<16x128xf32>
    %cst_43 = arith.constant 0.000000e+00 : f32
    %168 = vector.broadcast %cst_43 : f32 to vector<2x32xf32>
    %cst_44 = arith.constant 0.000000e+00 : f32
    %169 = vector.broadcast %cst_44 : f32 to vector<2x32xf32>
    %170 = vector.extract_strided_slice %167 {offsets = [0, 0], sizes = [2, 128], strides = [1, 1]} : vector<16x128xf32> to vector<2x128xf32>
    %cst_45 = arith.constant dense<0.000000e+00> : vector<2x128xf32>
    %171 = tpu.matmul %168, %162, %cst_45 {dimension_numbers = #tpu.dot_dimension_numbers<[1], [0], [0], [1], [0, 0, 1, 1], [], []>} : vector<2x32xf32>, vector<32x128xf32>, vector<2x128xf32> -> vector<2x128xf32>
    %172 = arith.addf %170, %171 : vector<2x128xf32>
    %173 = arith.negf %172 : vector<2x128xf32>
    %174 = math.exp %173 : vector<2x128xf32>
    %cst_46 = arith.constant 1.000000e+00 : f32
    %175 = vector.broadcast %cst_46 : f32 to vector<2x128xf32>
    %176 = arith.addf %175, %174 : vector<2x128xf32>
    %177 = arith.divf %175, %176 : vector<2x128xf32>
    %178 = math.tanh %172 : vector<2x128xf32>
    %179 = vector.extract_strided_slice %177 {offsets = [0, 0], sizes = [2, 32], strides = [1, 1]} : vector<2x128xf32> to vector<2x32xf32>
    %180 = vector.extract_strided_slice %177 {offsets = [0, 32], sizes = [2, 32], strides = [1, 1]} : vector<2x128xf32> to vector<2x32xf32>
    %181 = vector.extract_strided_slice %178 {offsets = [0, 64], sizes = [2, 32], strides = [1, 1]} : vector<2x128xf32> to vector<2x32xf32>
    %182 = vector.extract_strided_slice %177 {offsets = [0, 96], sizes = [2, 32], strides = [1, 1]} : vector<2x128xf32> to vector<2x32xf32>
    %183 = arith.mulf %180, %169 : vector<2x32xf32>
    %184 = arith.mulf %179, %181 : vector<2x32xf32>
    %185 = arith.addf %183, %184 : vector<2x32xf32>
    %186 = math.tanh %185 : vector<2x32xf32>
    %187 = arith.mulf %182, %186 : vector<2x32xf32>
    %c0_47 = arith.constant 0 : index
    %c0_48 = arith.constant 0 : index
    %188 = vector.load %arg13[%c0_47, %c0_48] : memref<16x32xf32, #tpu.memory_space<vmem>>, vector<2x32xf32>
    tpu.vector_store %arg13[%c0_47, %c0_48], %187 {strides = array<i32>} : memref<16x32xf32, #tpu.memory_space<vmem>>, vector<2x32xf32>,
    %189 = vector.extract_strided_slice %167 {offsets = [2, 0], sizes = [2, 128], strides = [1, 1]} : vector<16x128xf32> to vector<2x128xf32>
    %cst_49 = arith.constant dense<0.000000e+00> : vector<2x128xf32>
    %190 = tpu.matmul %187, %162, %cst_49 {dimension_numbers = #tpu.dot_dimension_numbers<[1], [0], [0], [1], [0, 0, 1, 1], [], []>} : vector<2x32xf32>, vector<32x128xf32>, vector<2x128xf32> -> vector<2x128xf32>
    %191 = arith.addf %189, %190 : vector<2x128xf32>
    %192 = arith.negf %191 : vector<2x128xf32>
    %193 = math.exp %192 : vector<2x128xf32>
    %cst_50 = arith.constant 1.000000e+00 : f32
    %194 = vector.broadcast %cst_50 : f32 to vector<2x128xf32>
    %195 = arith.addf %194, %193 : vector<2x128xf32>
    %196 = arith.divf %194, %195 : vector<2x128xf32>
    %197 = math.tanh %191 : vector<2x128xf32>
    %198 = vector.extract_strided_slice %196 {offsets = [0, 0], sizes = [2, 32], strides = [1, 1]} : vector<2x128xf32> to vector<2x32xf32>
    %199 = vector.extract_strided_slice %196 {offsets = [0, 32], sizes = [2, 32], strides = [1, 1]} : vector<2x128xf32> to vector<2x32xf32>
    %200 = vector.extract_strided_slice %197 {offsets = [0, 64], sizes = [2, 32], strides = [1, 1]} : vector<2x128xf32> to vector<2x32xf32>
    %201 = vector.extract_strided_slice %196 {offsets = [0, 96], sizes = [2, 32], strides = [1, 1]} : vector<2x128xf32> to vector<2x32xf32>
    %202 = arith.mulf %199, %185 : vector<2x32xf32>
    %203 = arith.mulf %198, %200 : vector<2x32xf32>
    %204 = arith.addf %202, %203 : vector<2x32xf32>
    %205 = math.tanh %204 : vector<2x32xf32>
    %206 = arith.mulf %201, %205 : vector<2x32xf32>
    %c2_51 = arith.constant 2 : index
    %c0_52 = arith.constant 0 : index
    %207 = vector.load %arg13[%c2_51, %c0_52] : memref<16x32xf32, #tpu.memory_space<vmem>>, vector<2x32xf32>
    tpu.vector_store %arg13[%c2_51, %c0_52], %206 {strides = array<i32>} : memref<16x32xf32, #tpu.memory_space<vmem>>, vector<2x32xf32>,
    %208 = vector.extract_strided_slice %167 {offsets = [4, 0], sizes = [2, 128], strides = [1, 1]} : vector<16x128xf32> to vector<2x128xf32>
    %cst_53 = arith.constant dense<0.000000e+00> : vector<2x128xf32>
    %209 = tpu.matmul %206, %162, %cst_53 {dimension_numbers = #tpu.dot_dimension_numbers<[1], [0], [0], [1], [0, 0, 1, 1], [], []>} : vector<2x32xf32>, vector<32x128xf32>, vector<2x128xf32> -> vector<2x128xf32>
    %210 = arith.addf %208, %209 : vector<2x128xf32>
    %211 = arith.negf %210 : vector<2x128xf32>
    %212 = math.exp %211 : vector<2x128xf32>
    %cst_54 = arith.constant 1.000000e+00 : f32
    %213 = vector.broadcast %cst_54 : f32 to vector<2x128xf32>
    %214 = arith.addf %213, %212 : vector<2x128xf32>
    %215 = arith.divf %213, %214 : vector<2x128xf32>
    %216 = math.tanh %210 : vector<2x128xf32>
    %217 = vector.extract_strided_slice %215 {offsets = [0, 0], sizes = [2, 32], strides = [1, 1]} : vector<2x128xf32> to vector<2x32xf32>
    %218 = vector.extract_strided_slice %215 {offsets = [0, 32], sizes = [2, 32], strides = [1, 1]} : vector<2x128xf32> to vector<2x32xf32>
    %219 = vector.extract_strided_slice %216 {offsets = [0, 64], sizes = [2, 32], strides = [1, 1]} : vector<2x128xf32> to vector<2x32xf32>
    %220 = vector.extract_strided_slice %215 {offsets = [0, 96], sizes = [2, 32], strides = [1, 1]} : vector<2x128xf32> to vector<2x32xf32>
    %221 = arith.mulf %218, %204 : vector<2x32xf32>
    %222 = arith.mulf %217, %219 : vector<2x32xf32>
    %223 = arith.addf %221, %222 : vector<2x32xf32>
    %224 = math.tanh %223 : vector<2x32xf32>
    %225 = arith.mulf %220, %224 : vector<2x32xf32>
    %c4_55 = arith.constant 4 : index
    %c0_56 = arith.constant 0 : index
    %226 = vector.load %arg13[%c4_55, %c0_56] : memref<16x32xf32, #tpu.memory_space<vmem>>, vector<2x32xf32>
    tpu.vector_store %arg13[%c4_55, %c0_56], %225 {strides = array<i32>} : memref<16x32xf32, #tpu.memory_space<vmem>>, vector<2x32xf32>,
    %227 = vector.extract_strided_slice %167 {offsets = [6, 0], sizes = [2, 128], strides = [1, 1]} : vector<16x128xf32> to vector<2x128xf32>
    %cst_57 = arith.constant dense<0.000000e+00> : vector<2x128xf32>
    %228 = tpu.matmul %225, %162, %cst_57 {dimension_numbers = #tpu.dot_dimension_numbers<[1], [0], [0], [1], [0, 0, 1, 1], [], []>} : vector<2x32xf32>, vector<32x128xf32>, vector<2x128xf32> -> vector<2x128xf32>
    %229 = arith.addf %227, %228 : vector<2x128xf32>
    %230 = arith.negf %229 : vector<2x128xf32>
    %231 = math.exp %230 : vector<2x128xf32>
    %cst_58 = arith.constant 1.000000e+00 : f32
    %232 = vector.broadcast %cst_58 : f32 to vector<2x128xf32>
    %233 = arith.addf %232, %231 : vector<2x128xf32>
    %234 = arith.divf %232, %233 : vector<2x128xf32>
    %235 = math.tanh %229 : vector<2x128xf32>
    %236 = vector.extract_strided_slice %234 {offsets = [0, 0], sizes = [2, 32], strides = [1, 1]} : vector<2x128xf32> to vector<2x32xf32>
    %237 = vector.extract_strided_slice %234 {offsets = [0, 32], sizes = [2, 32], strides = [1, 1]} : vector<2x128xf32> to vector<2x32xf32>
    %238 = vector.extract_strided_slice %235 {offsets = [0, 64], sizes = [2, 32], strides = [1, 1]} : vector<2x128xf32> to vector<2x32xf32>
    %239 = vector.extract_strided_slice %234 {offsets = [0, 96], sizes = [2, 32], strides = [1, 1]} : vector<2x128xf32> to vector<2x32xf32>
    %240 = arith.mulf %237, %223 : vector<2x32xf32>
    %241 = arith.mulf %236, %238 : vector<2x32xf32>
    %242 = arith.addf %240, %241 : vector<2x32xf32>
    %243 = math.tanh %242 : vector<2x32xf32>
    %244 = arith.mulf %239, %243 : vector<2x32xf32>
    %c6_59 = arith.constant 6 : index
    %c0_60 = arith.constant 0 : index
    %245 = vector.load %arg13[%c6_59, %c0_60] : memref<16x32xf32, #tpu.memory_space<vmem>>, vector<2x32xf32>
    tpu.vector_store %arg13[%c6_59, %c0_60], %244 {strides = array<i32>} : memref<16x32xf32, #tpu.memory_space<vmem>>, vector<2x32xf32>,
    %246 = vector.extract_strided_slice %167 {offsets = [8, 0], sizes = [2, 128], strides = [1, 1]} : vector<16x128xf32> to vector<2x128xf32>
    %cst_61 = arith.constant dense<0.000000e+00> : vector<2x128xf32>
    %247 = tpu.matmul %244, %162, %cst_61 {dimension_numbers = #tpu.dot_dimension_numbers<[1], [0], [0], [1], [0, 0, 1, 1], [], []>} : vector<2x32xf32>, vector<32x128xf32>, vector<2x128xf32> -> vector<2x128xf32>
    %248 = arith.addf %246, %247 : vector<2x128xf32>
    %249 = arith.negf %248 : vector<2x128xf32>
    %250 = math.exp %249 : vector<2x128xf32>
    %cst_62 = arith.constant 1.000000e+00 : f32
    %251 = vector.broadcast %cst_62 : f32 to vector<2x128xf32>
    %252 = arith.addf %251, %250 : vector<2x128xf32>
    %253 = arith.divf %251, %252 : vector<2x128xf32>
    %254 = math.tanh %248 : vector<2x128xf32>
    %255 = vector.extract_strided_slice %253 {offsets = [0, 0], sizes = [2, 32], strides = [1, 1]} : vector<2x128xf32> to vector<2x32xf32>
    %256 = vector.extract_strided_slice %253 {offsets = [0, 32], sizes = [2, 32], strides = [1, 1]} : vector<2x128xf32> to vector<2x32xf32>
    %257 = vector.extract_strided_slice %254 {offsets = [0, 64], sizes = [2, 32], strides = [1, 1]} : vector<2x128xf32> to vector<2x32xf32>
    %258 = vector.extract_strided_slice %253 {offsets = [0, 96], sizes = [2, 32], strides = [1, 1]} : vector<2x128xf32> to vector<2x32xf32>
    %259 = arith.mulf %256, %242 : vector<2x32xf32>
    %260 = arith.mulf %255, %257 : vector<2x32xf32>
    %261 = arith.addf %259, %260 : vector<2x32xf32>
    %262 = math.tanh %261 : vector<2x32xf32>
    %263 = arith.mulf %258, %262 : vector<2x32xf32>
    %c8_63 = arith.constant 8 : index
    %c0_64 = arith.constant 0 : index
    %264 = vector.load %arg13[%c8_63, %c0_64] : memref<16x32xf32, #tpu.memory_space<vmem>>, vector<2x32xf32>
    tpu.vector_store %arg13[%c8_63, %c0_64], %263 {strides = array<i32>} : memref<16x32xf32, #tpu.memory_space<vmem>>, vector<2x32xf32>,
    %265 = vector.extract_strided_slice %167 {offsets = [10, 0], sizes = [2, 128], strides = [1, 1]} : vector<16x128xf32> to vector<2x128xf32>
    %cst_65 = arith.constant dense<0.000000e+00> : vector<2x128xf32>
    %266 = tpu.matmul %263, %162, %cst_65 {dimension_numbers = #tpu.dot_dimension_numbers<[1], [0], [0], [1], [0, 0, 1, 1], [], []>} : vector<2x32xf32>, vector<32x128xf32>, vector<2x128xf32> -> vector<2x128xf32>
    %267 = arith.addf %265, %266 : vector<2x128xf32>
    %268 = arith.negf %267 : vector<2x128xf32>
    %269 = math.exp %268 : vector<2x128xf32>
    %cst_66 = arith.constant 1.000000e+00 : f32
    %270 = vector.broadcast %cst_66 : f32 to vector<2x128xf32>
    %271 = arith.addf %270, %269 : vector<2x128xf32>
    %272 = arith.divf %270, %271 : vector<2x128xf32>
    %273 = math.tanh %267 : vector<2x128xf32>
    %274 = vector.extract_strided_slice %272 {offsets = [0, 0], sizes = [2, 32], strides = [1, 1]} : vector<2x128xf32> to vector<2x32xf32>
    %275 = vector.extract_strided_slice %272 {offsets = [0, 32], sizes = [2, 32], strides = [1, 1]} : vector<2x128xf32> to vector<2x32xf32>
    %276 = vector.extract_strided_slice %273 {offsets = [0, 64], sizes = [2, 32], strides = [1, 1]} : vector<2x128xf32> to vector<2x32xf32>
    %277 = vector.extract_strided_slice %272 {offsets = [0, 96], sizes = [2, 32], strides = [1, 1]} : vector<2x128xf32> to vector<2x32xf32>
    %278 = arith.mulf %275, %261 : vector<2x32xf32>
    %279 = arith.mulf %274, %276 : vector<2x32xf32>
    %280 = arith.addf %278, %279 : vector<2x32xf32>
    %281 = math.tanh %280 : vector<2x32xf32>
    %282 = arith.mulf %277, %281 : vector<2x32xf32>
    %c10_67 = arith.constant 10 : index
    %c0_68 = arith.constant 0 : index
    %283 = vector.load %arg13[%c10_67, %c0_68] : memref<16x32xf32, #tpu.memory_space<vmem>>, vector<2x32xf32>
    tpu.vector_store %arg13[%c10_67, %c0_68], %282 {strides = array<i32>} : memref<16x32xf32, #tpu.memory_space<vmem>>, vector<2x32xf32>,
    %284 = vector.extract_strided_slice %167 {offsets = [12, 0], sizes = [2, 128], strides = [1, 1]} : vector<16x128xf32> to vector<2x128xf32>
    %cst_69 = arith.constant dense<0.000000e+00> : vector<2x128xf32>
    %285 = tpu.matmul %282, %162, %cst_69 {dimension_numbers = #tpu.dot_dimension_numbers<[1], [0], [0], [1], [0, 0, 1, 1], [], []>} : vector<2x32xf32>, vector<32x128xf32>, vector<2x128xf32> -> vector<2x128xf32>
    %286 = arith.addf %284, %285 : vector<2x128xf32>
    %287 = arith.negf %286 : vector<2x128xf32>
    %288 = math.exp %287 : vector<2x128xf32>
    %cst_70 = arith.constant 1.000000e+00 : f32
    %289 = vector.broadcast %cst_70 : f32 to vector<2x128xf32>
    %290 = arith.addf %289, %288 : vector<2x128xf32>
    %291 = arith.divf %289, %290 : vector<2x128xf32>
    %292 = math.tanh %286 : vector<2x128xf32>
    %293 = vector.extract_strided_slice %291 {offsets = [0, 0], sizes = [2, 32], strides = [1, 1]} : vector<2x128xf32> to vector<2x32xf32>
    %294 = vector.extract_strided_slice %291 {offsets = [0, 32], sizes = [2, 32], strides = [1, 1]} : vector<2x128xf32> to vector<2x32xf32>
    %295 = vector.extract_strided_slice %292 {offsets = [0, 64], sizes = [2, 32], strides = [1, 1]} : vector<2x128xf32> to vector<2x32xf32>
    %296 = vector.extract_strided_slice %291 {offsets = [0, 96], sizes = [2, 32], strides = [1, 1]} : vector<2x128xf32> to vector<2x32xf32>
    %297 = arith.mulf %294, %280 : vector<2x32xf32>
    %298 = arith.mulf %293, %295 : vector<2x32xf32>
    %299 = arith.addf %297, %298 : vector<2x32xf32>
    %300 = math.tanh %299 : vector<2x32xf32>
    %301 = arith.mulf %296, %300 : vector<2x32xf32>
    %c12_71 = arith.constant 12 : index
    %c0_72 = arith.constant 0 : index
    %302 = vector.load %arg13[%c12_71, %c0_72] : memref<16x32xf32, #tpu.memory_space<vmem>>, vector<2x32xf32>
    tpu.vector_store %arg13[%c12_71, %c0_72], %301 {strides = array<i32>} : memref<16x32xf32, #tpu.memory_space<vmem>>, vector<2x32xf32>,
    %303 = vector.extract_strided_slice %167 {offsets = [14, 0], sizes = [2, 128], strides = [1, 1]} : vector<16x128xf32> to vector<2x128xf32>
    %cst_73 = arith.constant dense<0.000000e+00> : vector<2x128xf32>
    %304 = tpu.matmul %301, %162, %cst_73 {dimension_numbers = #tpu.dot_dimension_numbers<[1], [0], [0], [1], [0, 0, 1, 1], [], []>} : vector<2x32xf32>, vector<32x128xf32>, vector<2x128xf32> -> vector<2x128xf32>
    %305 = arith.addf %303, %304 : vector<2x128xf32>
    %306 = arith.negf %305 : vector<2x128xf32>
    %307 = math.exp %306 : vector<2x128xf32>
    %cst_74 = arith.constant 1.000000e+00 : f32
    %308 = vector.broadcast %cst_74 : f32 to vector<2x128xf32>
    %309 = arith.addf %308, %307 : vector<2x128xf32>
    %310 = arith.divf %308, %309 : vector<2x128xf32>
    %311 = math.tanh %305 : vector<2x128xf32>
    %312 = vector.extract_strided_slice %310 {offsets = [0, 0], sizes = [2, 32], strides = [1, 1]} : vector<2x128xf32> to vector<2x32xf32>
    %313 = vector.extract_strided_slice %310 {offsets = [0, 32], sizes = [2, 32], strides = [1, 1]} : vector<2x128xf32> to vector<2x32xf32>
    %314 = vector.extract_strided_slice %311 {offsets = [0, 64], sizes = [2, 32], strides = [1, 1]} : vector<2x128xf32> to vector<2x32xf32>
    %315 = vector.extract_strided_slice %310 {offsets = [0, 96], sizes = [2, 32], strides = [1, 1]} : vector<2x128xf32> to vector<2x32xf32>
    %316 = arith.mulf %313, %299 : vector<2x32xf32>
    %317 = arith.mulf %312, %314 : vector<2x32xf32>
    %318 = arith.addf %316, %317 : vector<2x32xf32>
    %319 = math.tanh %318 : vector<2x32xf32>
    %320 = arith.mulf %315, %319 : vector<2x32xf32>
    %c14_75 = arith.constant 14 : index
    %c0_76 = arith.constant 0 : index
    %321 = vector.load %arg13[%c14_75, %c0_76] : memref<16x32xf32, #tpu.memory_space<vmem>>, vector<2x32xf32>
    tpu.vector_store %arg13[%c14_75, %c0_76], %320 {strides = array<i32>} : memref<16x32xf32, #tpu.memory_space<vmem>>, vector<2x32xf32>,
    %c0_77 = arith.constant 0 : index
    %c0_78 = arith.constant 0 : index
    %322 = vector.load %arg13[%c0_77, %c0_78] : memref<16x32xf32, #tpu.memory_space<vmem>>, vector<16x32xf32>
    %c0_79 = arith.constant 0 : index
    %c0_80 = arith.constant 0 : index
    %323 = vector.load %arg8[%c0_79, %c0_80] : memref<32x128xf32, #tpu.memory_space<vmem>>, vector<32x128xf32>
    %c0_81 = arith.constant 0 : index
    %c0_82 = arith.constant 0 : index
    %324 = vector.load %arg7[%c0_81, %c0_82] : memref<32x128xf32, #tpu.memory_space<vmem>>, vector<32x128xf32>
    %cst_83 = arith.constant dense<0.000000e+00> : vector<16x128xf32>
    %325 = tpu.matmul %322, %324, %cst_83 {dimension_numbers = #tpu.dot_dimension_numbers<[1], [0], [0], [1], [0, 0, 1, 1], [], []>} : vector<16x32xf32>, vector<32x128xf32>, vector<16x128xf32> -> vector<16x128xf32>
    %c0_84 = arith.constant 0 : index
    %c0_85 = arith.constant 0 : index
    %326 = vector.load %arg9[%c0_84, %c0_85] : memref<1x128xf32, #tpu.memory_space<vmem>>, vector<1x128xf32>
    %327 = vector.broadcast %326 : vector<1x128xf32> to vector<16x128xf32>
    %328 = arith.addf %325, %327 : vector<16x128xf32>
    %cst_86 = arith.constant 0.000000e+00 : f32
    %329 = vector.broadcast %cst_86 : f32 to vector<2x32xf32>
    %cst_87 = arith.constant 0.000000e+00 : f32
    %330 = vector.broadcast %cst_87 : f32 to vector<2x32xf32>
    %331 = vector.extract_strided_slice %328 {offsets = [0, 0], sizes = [2, 128], strides = [1, 1]} : vector<16x128xf32> to vector<2x128xf32>
    %cst_88 = arith.constant dense<0.000000e+00> : vector<2x128xf32>
    %332 = tpu.matmul %329, %323, %cst_88 {dimension_numbers = #tpu.dot_dimension_numbers<[1], [0], [0], [1], [0, 0, 1, 1], [], []>} : vector<2x32xf32>, vector<32x128xf32>, vector<2x128xf32> -> vector<2x128xf32>
    %333 = arith.addf %331, %332 : vector<2x128xf32>
    %334 = arith.negf %333 : vector<2x128xf32>
    %335 = math.exp %334 : vector<2x128xf32>
    %cst_89 = arith.constant 1.000000e+00 : f32
    %336 = vector.broadcast %cst_89 : f32 to vector<2x128xf32>
    %337 = arith.addf %336, %335 : vector<2x128xf32>
    %338 = arith.divf %336, %337 : vector<2x128xf32>
    %339 = math.tanh %333 : vector<2x128xf32>
    %340 = vector.extract_strided_slice %338 {offsets = [0, 0], sizes = [2, 32], strides = [1, 1]} : vector<2x128xf32> to vector<2x32xf32>
    %341 = vector.extract_strided_slice %338 {offsets = [0, 32], sizes = [2, 32], strides = [1, 1]} : vector<2x128xf32> to vector<2x32xf32>
    %342 = vector.extract_strided_slice %339 {offsets = [0, 64], sizes = [2, 32], strides = [1, 1]} : vector<2x128xf32> to vector<2x32xf32>
    %343 = vector.extract_strided_slice %338 {offsets = [0, 96], sizes = [2, 32], strides = [1, 1]} : vector<2x128xf32> to vector<2x32xf32>
    %344 = arith.mulf %341, %330 : vector<2x32xf32>
    %345 = arith.mulf %340, %342 : vector<2x32xf32>
    %346 = arith.addf %344, %345 : vector<2x32xf32>
    %347 = math.tanh %346 : vector<2x32xf32>
    %348 = arith.mulf %343, %347 : vector<2x32xf32>
    %349 = vector.extract_strided_slice %328 {offsets = [2, 0], sizes = [2, 128], strides = [1, 1]} : vector<16x128xf32> to vector<2x128xf32>
    %cst_90 = arith.constant dense<0.000000e+00> : vector<2x128xf32>
    %350 = tpu.matmul %348, %323, %cst_90 {dimension_numbers = #tpu.dot_dimension_numbers<[1], [0], [0], [1], [0, 0, 1, 1], [], []>} : vector<2x32xf32>, vector<32x128xf32>, vector<2x128xf32> -> vector<2x128xf32>
    %351 = arith.addf %349, %350 : vector<2x128xf32>
    %352 = arith.negf %351 : vector<2x128xf32>
    %353 = math.exp %352 : vector<2x128xf32>
    %cst_91 = arith.constant 1.000000e+00 : f32
    %354 = vector.broadcast %cst_91 : f32 to vector<2x128xf32>
    %355 = arith.addf %354, %353 : vector<2x128xf32>
    %356 = arith.divf %354, %355 : vector<2x128xf32>
    %357 = math.tanh %351 : vector<2x128xf32>
    %358 = vector.extract_strided_slice %356 {offsets = [0, 0], sizes = [2, 32], strides = [1, 1]} : vector<2x128xf32> to vector<2x32xf32>
    %359 = vector.extract_strided_slice %356 {offsets = [0, 32], sizes = [2, 32], strides = [1, 1]} : vector<2x128xf32> to vector<2x32xf32>
    %360 = vector.extract_strided_slice %357 {offsets = [0, 64], sizes = [2, 32], strides = [1, 1]} : vector<2x128xf32> to vector<2x32xf32>
    %361 = vector.extract_strided_slice %356 {offsets = [0, 96], sizes = [2, 32], strides = [1, 1]} : vector<2x128xf32> to vector<2x32xf32>
    %362 = arith.mulf %359, %346 : vector<2x32xf32>
    %363 = arith.mulf %358, %360 : vector<2x32xf32>
    %364 = arith.addf %362, %363 : vector<2x32xf32>
    %365 = math.tanh %364 : vector<2x32xf32>
    %366 = arith.mulf %361, %365 : vector<2x32xf32>
    %367 = vector.extract_strided_slice %328 {offsets = [4, 0], sizes = [2, 128], strides = [1, 1]} : vector<16x128xf32> to vector<2x128xf32>
    %cst_92 = arith.constant dense<0.000000e+00> : vector<2x128xf32>
    %368 = tpu.matmul %366, %323, %cst_92 {dimension_numbers = #tpu.dot_dimension_numbers<[1], [0], [0], [1], [0, 0, 1, 1], [], []>} : vector<2x32xf32>, vector<32x128xf32>, vector<2x128xf32> -> vector<2x128xf32>
    %369 = arith.addf %367, %368 : vector<2x128xf32>
    %370 = arith.negf %369 : vector<2x128xf32>
    %371 = math.exp %370 : vector<2x128xf32>
    %cst_93 = arith.constant 1.000000e+00 : f32
    %372 = vector.broadcast %cst_93 : f32 to vector<2x128xf32>
    %373 = arith.addf %372, %371 : vector<2x128xf32>
    %374 = arith.divf %372, %373 : vector<2x128xf32>
    %375 = math.tanh %369 : vector<2x128xf32>
    %376 = vector.extract_strided_slice %374 {offsets = [0, 0], sizes = [2, 32], strides = [1, 1]} : vector<2x128xf32> to vector<2x32xf32>
    %377 = vector.extract_strided_slice %374 {offsets = [0, 32], sizes = [2, 32], strides = [1, 1]} : vector<2x128xf32> to vector<2x32xf32>
    %378 = vector.extract_strided_slice %375 {offsets = [0, 64], sizes = [2, 32], strides = [1, 1]} : vector<2x128xf32> to vector<2x32xf32>
    %379 = vector.extract_strided_slice %374 {offsets = [0, 96], sizes = [2, 32], strides = [1, 1]} : vector<2x128xf32> to vector<2x32xf32>
    %380 = arith.mulf %377, %364 : vector<2x32xf32>
    %381 = arith.mulf %376, %378 : vector<2x32xf32>
    %382 = arith.addf %380, %381 : vector<2x32xf32>
    %383 = math.tanh %382 : vector<2x32xf32>
    %384 = arith.mulf %379, %383 : vector<2x32xf32>
    %385 = vector.extract_strided_slice %328 {offsets = [6, 0], sizes = [2, 128], strides = [1, 1]} : vector<16x128xf32> to vector<2x128xf32>
    %cst_94 = arith.constant dense<0.000000e+00> : vector<2x128xf32>
    %386 = tpu.matmul %384, %323, %cst_94 {dimension_numbers = #tpu.dot_dimension_numbers<[1], [0], [0], [1], [0, 0, 1, 1], [], []>} : vector<2x32xf32>, vector<32x128xf32>, vector<2x128xf32> -> vector<2x128xf32>
    %387 = arith.addf %385, %386 : vector<2x128xf32>
    %388 = arith.negf %387 : vector<2x128xf32>
    %389 = math.exp %388 : vector<2x128xf32>
    %cst_95 = arith.constant 1.000000e+00 : f32
    %390 = vector.broadcast %cst_95 : f32 to vector<2x128xf32>
    %391 = arith.addf %390, %389 : vector<2x128xf32>
    %392 = arith.divf %390, %391 : vector<2x128xf32>
    %393 = math.tanh %387 : vector<2x128xf32>
    %394 = vector.extract_strided_slice %392 {offsets = [0, 0], sizes = [2, 32], strides = [1, 1]} : vector<2x128xf32> to vector<2x32xf32>
    %395 = vector.extract_strided_slice %392 {offsets = [0, 32], sizes = [2, 32], strides = [1, 1]} : vector<2x128xf32> to vector<2x32xf32>
    %396 = vector.extract_strided_slice %393 {offsets = [0, 64], sizes = [2, 32], strides = [1, 1]} : vector<2x128xf32> to vector<2x32xf32>
    %397 = vector.extract_strided_slice %392 {offsets = [0, 96], sizes = [2, 32], strides = [1, 1]} : vector<2x128xf32> to vector<2x32xf32>
    %398 = arith.mulf %395, %382 : vector<2x32xf32>
    %399 = arith.mulf %394, %396 : vector<2x32xf32>
    %400 = arith.addf %398, %399 : vector<2x32xf32>
    %401 = math.tanh %400 : vector<2x32xf32>
    %402 = arith.mulf %397, %401 : vector<2x32xf32>
    %403 = vector.extract_strided_slice %328 {offsets = [8, 0], sizes = [2, 128], strides = [1, 1]} : vector<16x128xf32> to vector<2x128xf32>
    %cst_96 = arith.constant dense<0.000000e+00> : vector<2x128xf32>
    %404 = tpu.matmul %402, %323, %cst_96 {dimension_numbers = #tpu.dot_dimension_numbers<[1], [0], [0], [1], [0, 0, 1, 1], [], []>} : vector<2x32xf32>, vector<32x128xf32>, vector<2x128xf32> -> vector<2x128xf32>
    %405 = arith.addf %403, %404 : vector<2x128xf32>
    %406 = arith.negf %405 : vector<2x128xf32>
    %407 = math.exp %406 : vector<2x128xf32>
    %cst_97 = arith.constant 1.000000e+00 : f32
    %408 = vector.broadcast %cst_97 : f32 to vector<2x128xf32>
    %409 = arith.addf %408, %407 : vector<2x128xf32>
    %410 = arith.divf %408, %409 : vector<2x128xf32>
    %411 = math.tanh %405 : vector<2x128xf32>
    %412 = vector.extract_strided_slice %410 {offsets = [0, 0], sizes = [2, 32], strides = [1, 1]} : vector<2x128xf32> to vector<2x32xf32>
    %413 = vector.extract_strided_slice %410 {offsets = [0, 32], sizes = [2, 32], strides = [1, 1]} : vector<2x128xf32> to vector<2x32xf32>
    %414 = vector.extract_strided_slice %411 {offsets = [0, 64], sizes = [2, 32], strides = [1, 1]} : vector<2x128xf32> to vector<2x32xf32>
    %415 = vector.extract_strided_slice %410 {offsets = [0, 96], sizes = [2, 32], strides = [1, 1]} : vector<2x128xf32> to vector<2x32xf32>
    %416 = arith.mulf %413, %400 : vector<2x32xf32>
    %417 = arith.mulf %412, %414 : vector<2x32xf32>
    %418 = arith.addf %416, %417 : vector<2x32xf32>
    %419 = math.tanh %418 : vector<2x32xf32>
    %420 = arith.mulf %415, %419 : vector<2x32xf32>
    %421 = vector.extract_strided_slice %328 {offsets = [10, 0], sizes = [2, 128], strides = [1, 1]} : vector<16x128xf32> to vector<2x128xf32>
    %cst_98 = arith.constant dense<0.000000e+00> : vector<2x128xf32>
    %422 = tpu.matmul %420, %323, %cst_98 {dimension_numbers = #tpu.dot_dimension_numbers<[1], [0], [0], [1], [0, 0, 1, 1], [], []>} : vector<2x32xf32>, vector<32x128xf32>, vector<2x128xf32> -> vector<2x128xf32>
    %423 = arith.addf %421, %422 : vector<2x128xf32>
    %424 = arith.negf %423 : vector<2x128xf32>
    %425 = math.exp %424 : vector<2x128xf32>
    %cst_99 = arith.constant 1.000000e+00 : f32
    %426 = vector.broadcast %cst_99 : f32 to vector<2x128xf32>
    %427 = arith.addf %426, %425 : vector<2x128xf32>
    %428 = arith.divf %426, %427 : vector<2x128xf32>
    %429 = math.tanh %423 : vector<2x128xf32>
    %430 = vector.extract_strided_slice %428 {offsets = [0, 0], sizes = [2, 32], strides = [1, 1]} : vector<2x128xf32> to vector<2x32xf32>
    %431 = vector.extract_strided_slice %428 {offsets = [0, 32], sizes = [2, 32], strides = [1, 1]} : vector<2x128xf32> to vector<2x32xf32>
    %432 = vector.extract_strided_slice %429 {offsets = [0, 64], sizes = [2, 32], strides = [1, 1]} : vector<2x128xf32> to vector<2x32xf32>
    %433 = vector.extract_strided_slice %428 {offsets = [0, 96], sizes = [2, 32], strides = [1, 1]} : vector<2x128xf32> to vector<2x32xf32>
    %434 = arith.mulf %431, %418 : vector<2x32xf32>
    %435 = arith.mulf %430, %432 : vector<2x32xf32>
    %436 = arith.addf %434, %435 : vector<2x32xf32>
    %437 = math.tanh %436 : vector<2x32xf32>
    %438 = arith.mulf %433, %437 : vector<2x32xf32>
    %439 = vector.extract_strided_slice %328 {offsets = [12, 0], sizes = [2, 128], strides = [1, 1]} : vector<16x128xf32> to vector<2x128xf32>
    %cst_100 = arith.constant dense<0.000000e+00> : vector<2x128xf32>
    %440 = tpu.matmul %438, %323, %cst_100 {dimension_numbers = #tpu.dot_dimension_numbers<[1], [0], [0], [1], [0, 0, 1, 1], [], []>} : vector<2x32xf32>, vector<32x128xf32>, vector<2x128xf32> -> vector<2x128xf32>
    %441 = arith.addf %439, %440 : vector<2x128xf32>
    %442 = arith.negf %441 : vector<2x128xf32>
    %443 = math.exp %442 : vector<2x128xf32>
    %cst_101 = arith.constant 1.000000e+00 : f32
    %444 = vector.broadcast %cst_101 : f32 to vector<2x128xf32>
    %445 = arith.addf %444, %443 : vector<2x128xf32>
    %446 = arith.divf %444, %445 : vector<2x128xf32>
    %447 = math.tanh %441 : vector<2x128xf32>
    %448 = vector.extract_strided_slice %446 {offsets = [0, 0], sizes = [2, 32], strides = [1, 1]} : vector<2x128xf32> to vector<2x32xf32>
    %449 = vector.extract_strided_slice %446 {offsets = [0, 32], sizes = [2, 32], strides = [1, 1]} : vector<2x128xf32> to vector<2x32xf32>
    %450 = vector.extract_strided_slice %447 {offsets = [0, 64], sizes = [2, 32], strides = [1, 1]} : vector<2x128xf32> to vector<2x32xf32>
    %451 = vector.extract_strided_slice %446 {offsets = [0, 96], sizes = [2, 32], strides = [1, 1]} : vector<2x128xf32> to vector<2x32xf32>
    %452 = arith.mulf %449, %436 : vector<2x32xf32>
    %453 = arith.mulf %448, %450 : vector<2x32xf32>
    %454 = arith.addf %452, %453 : vector<2x32xf32>
    %455 = math.tanh %454 : vector<2x32xf32>
    %456 = arith.mulf %451, %455 : vector<2x32xf32>
    %457 = vector.extract_strided_slice %328 {offsets = [14, 0], sizes = [2, 128], strides = [1, 1]} : vector<16x128xf32> to vector<2x128xf32>
    %cst_102 = arith.constant dense<0.000000e+00> : vector<2x128xf32>
    %458 = tpu.matmul %456, %323, %cst_102 {dimension_numbers = #tpu.dot_dimension_numbers<[1], [0], [0], [1], [0, 0, 1, 1], [], []>} : vector<2x32xf32>, vector<32x128xf32>, vector<2x128xf32> -> vector<2x128xf32>
    %459 = arith.addf %457, %458 : vector<2x128xf32>
    %460 = arith.negf %459 : vector<2x128xf32>
    %461 = math.exp %460 : vector<2x128xf32>
    %cst_103 = arith.constant 1.000000e+00 : f32
    %462 = vector.broadcast %cst_103 : f32 to vector<2x128xf32>
    %463 = arith.addf %462, %461 : vector<2x128xf32>
    %464 = arith.divf %462, %463 : vector<2x128xf32>
    %465 = math.tanh %459 : vector<2x128xf32>
    %466 = vector.extract_strided_slice %464 {offsets = [0, 0], sizes = [2, 32], strides = [1, 1]} : vector<2x128xf32> to vector<2x32xf32>
    %467 = vector.extract_strided_slice %464 {offsets = [0, 32], sizes = [2, 32], strides = [1, 1]} : vector<2x128xf32> to vector<2x32xf32>
    %468 = vector.extract_strided_slice %465 {offsets = [0, 64], sizes = [2, 32], strides = [1, 1]} : vector<2x128xf32> to vector<2x32xf32>
    %469 = vector.extract_strided_slice %464 {offsets = [0, 96], sizes = [2, 32], strides = [1, 1]} : vector<2x128xf32> to vector<2x32xf32>
    %470 = arith.mulf %467, %454 : vector<2x32xf32>
    %471 = arith.mulf %466, %468 : vector<2x32xf32>
    %472 = arith.addf %470, %471 : vector<2x32xf32>
    %473 = math.tanh %472 : vector<2x32xf32>
    %474 = arith.mulf %469, %473 : vector<2x32xf32>
    %c0_104 = arith.constant 0 : index
    %c0_105 = arith.constant 0 : index
    %475 = vector.load %arg10[%c0_104, %c0_105] : memref<32x1xf32, #tpu.memory_space<vmem>>, vector<32x1xf32>
    %cst_106 = arith.constant dense<0.000000e+00> : vector<2x1xf32>
    %476 = tpu.matmul %474, %475, %cst_106 {dimension_numbers = #tpu.dot_dimension_numbers<[1], [0], [0], [1], [0, 0, 1, 1], [], []>} : vector<2x32xf32>, vector<32x1xf32>, vector<2x1xf32> -> vector<2x1xf32>
    %c0_107 = arith.constant 0 : index
    %c0_108 = arith.constant 0 : index
    %477 = vector.load %arg11[%c0_107, %c0_108] : memref<1x1xf32, #tpu.memory_space<vmem>>, vector<1x1xf32>
    %478 = vector.broadcast %477 : vector<1x1xf32> to vector<2x1xf32>
    %479 = arith.addf %476, %478 : vector<2x1xf32>
    %480 = arith.negf %479 : vector<2x1xf32>
    %481 = math.exp %480 : vector<2x1xf32>
    %cst_109 = arith.constant 1.000000e+00 : f32
    %482 = vector.broadcast %cst_109 : f32 to vector<2x1xf32>
    %483 = arith.addf %482, %481 : vector<2x1xf32>
    %484 = arith.divf %482, %483 : vector<2x1xf32>
    %c0_110 = arith.constant 0 : index
    %c0_111 = arith.constant 0 : index
    %485 = vector.load %arg12[%c0_110, %c0_111] : memref<2x1xf32, #tpu.memory_space<vmem>>, vector<2x1xf32>
    tpu.vector_store %arg12[%c0_110, %c0_111], %484 {strides = array<i32>} : memref<2x1xf32, #tpu.memory_space<vmem>>, vector<2x1xf32>,
    return
  }
}

</mosaic_0001>

<bundles_post_ra>
// kernel: tpu_custom_call.1
= control target key start
LH: loop header
LB: loop body
LE: loop exit
PB: predicated region body
PF: predicated region fallthrough
CT: control target
= control target key end

     0   :  { %s4583_s0 = inlined_call_operand.hbm [shape: f32[16,16], index: 0, kind: input, shape index: {}]   ;;  %s4584_s1 = inlined_call_operand.hbm [shape: f32[16,128], index: 1, kind: input, shape index: {}]   ;;  %s4585_s2 = inlined_call_operand.vmem [shape: f32[32,128], index: 2, kind: input, shape index: {}]   ;;  %s4586_s3 = inlined_call_operand.vmem [shape: f32[1,128], index: 3, kind: input, shape index: {}]   ;;  %s4587_s4 = inlined_call_operand.hbm [shape: f32[32,128], index: 4, kind: input, shape index: {}]   ;;  %s4588_s5 = inlined_call_operand.hbm [shape: f32[32,128], index: 5, kind: input, shape index: {}]   ;;  %s4589_s6 = inlined_call_operand.vmem [shape: f32[1,128], index: 6, kind: input, shape index: {}]   ;;  %s4590_s7 = inlined_call_operand.hbm [shape: f32[32,128], index: 7, kind: input, shape index: {}]   ;;  %s4591_s8 = inlined_call_operand.hbm [shape: f32[32,128], index: 8, kind: input, shape index: {}]   ;;  %s4592_s9 = inlined_call_operand.vmem [shape: f32[1,128], index: 9, kind: input, shape index: {}]   ;;  %s4593_s10 = inlined_call_operand.vmem [shape: f32[32,1], index: 10, kind: input, shape index: {}]   ;;  %s4594_s11 = inlined_call_operand.<no memory space> [shape: f32[1,1], index: 11, kind: input, shape index: {}]   ;;  %s4595_s12 = inlined_call_operand.vmem [shape: f32[2,1], index: 12, kind: output, shape index: {}]  }
   0x1   :  { %v17_v0 = vstv %s4594_s11 }
   0x2   :  { %18 = vst [vmem:[#allocation3] sm:$0x1] %v17_v0 }
   0x3   :  { %19 = vsyncpa [#allocation5], 0 }
   0x4   :  { %20 = vsyncpa [#allocation7], 0 }
   0x5   :  { %21 = vsyncpa [#allocation10], 0 }
   0x6   :  { %22 = vsyncpa [#allocation13], 0  ;;  %s3942_s23 = smov [#allocation6]   ;;  %s3943_s25 = smov [#allocation9]  }
   0x7   :  { %s40_s24 = sshll.u32 %s3942_s23, 4  ;;  %s68_s26 = sshll.u32 %s3943_s25, 4  ;;  %s41_s24 = int_to_ptr.vmem [resolvable:$true] %s40_s24  ;;  %s69_s26 = int_to_ptr.vmem [resolvable:$true] %s68_s26 }
   0x8   :  { %s3822_s27 = scalar_lea.vmem %s41_s24, 256  ;;  %p3827_p1 = scmp.lt.s32.totalorder %s41_s24, %s41_s24 }
   0x9   :  { %p3823_p0 = scmp.ne.s32.totalorder %s41_s24, %s3822_s27  ;;  %p3828_p2 = scmp.lt.s32.totalorder %s3822_s27, %s3822_s27 }
   0xb   :  { %p3829_p3 = por %p3828_p2, %p3827_p1 }
   0xd   :  { %p3830_p4 = pnand %p3829_p3, %p3823_p0 }
   0xf   :  { %3833 = shalt.err (!%p3830_p4)
}
  0x10   :  { %s3944_s28 = smov 128   ;;  %s3945_s11 = smov 8  }
  0x11   :  { %46 = dma.hbm_to_vmem [thread:$0]  %s4584_s1, 256, %s41_s24, [#allocation7], %s3944_s28, %s3944_s28, %s3945_s11  }
  0x12   :  { %s3842_s13 = scalar_lea.vmem %s69_s26, 512  ;;  %p3847_p6 = scmp.lt.s32.totalorder %s69_s26, %s69_s26 }
  0x13   :  { %p3843_p5 = scmp.ne.s32.totalorder %s69_s26, %s3842_s13  ;;  %p3848_p7 = scmp.lt.s32.totalorder %s3842_s13, %s3842_s13 }
  0x15   :  { %p3849_p8 = por %p3848_p7, %p3847_p6 }
  0x17   :  { %p3850_p9 = pnand %p3849_p8, %p3843_p5 }
  0x19   :  { %3853 = shalt.err (!%p3850_p9)
}
  0x1a   :  { %74 = dma.hbm_to_vmem [thread:$0]  %s4588_s5, 512, %s69_s26, [#allocation10], %s3944_s28, %s3944_s28, %s3945_s11  }
  0x1b   :  { %s3946_s16 = smov [#allocation4]   ;;  %s3947_s18 = smov [#allocation8]  }
  0x1c   :  { %s28_s17 = sshll.u32 %s3946_s16, 4  ;;  %s56_s19 = sshll.u32 %s3947_s18, 4  ;;  %s29_s17 = int_to_ptr.vmem [resolvable:$true] %s28_s17  ;;  %s57_s19 = int_to_ptr.vmem [resolvable:$true] %s56_s19 }
  0x1d   :  { %s3862_s1 = scalar_lea.vmem %s29_s17, 256  ;;  %p3867_p11 = scmp.lt.s32.totalorder %s29_s17, %s29_s17 }
  0x1e   :  { %p3863_p10 = scmp.ne.s32.totalorder %s29_s17, %s3862_s1  ;;  %p3868_p12 = scmp.lt.s32.totalorder %s3862_s1, %s3862_s1 }
  0x20   :  { %p3869_p13 = por %p3868_p12, %p3867_p11 }
  0x22   :  { %p3870_p0 = pnand %p3869_p13, %p3863_p10 }
  0x24   :  { %3873 = shalt.err (!%p3870_p0)
}
  0x25   :  { %34 = dma.hbm_to_vmem [thread:$0]  %s4583_s0, 256, %s29_s17, [#allocation5], %s3944_s28, %s3944_s28, %s3945_s11  }
  0x26   :  { %s3882_s5 = scalar_lea.vmem %s57_s19, 512  ;;  %p3887_p2 = scmp.lt.s32.totalorder %s57_s19, %s57_s19 }
  0x27   :  { %p3883_p1 = scmp.ne.s32.totalorder %s57_s19, %s3882_s5  ;;  %p3888_p3 = scmp.lt.s32.totalorder %s3882_s5, %s3882_s5 }
  0x29   :  { %p3889_p4 = por %p3888_p3, %p3887_p2 }
  0x2b   :  { %p3890_p5 = pnand %p3889_p4, %p3883_p1 }
  0x2d   :  { %3893 = shalt.err (!%p3890_p5)
}
  0x2e   :  { %62 = dma.hbm_to_vmem [thread:$0]  %s4587_s4, 512, %s57_s19, [#allocation7], %s3944_s28, %s3944_s28, %s3945_s11  }
  0x2f   :  { %s3948_s24 = smov [#allocation11]   ;;  %s3949_s26 = smov [#allocation12]  }
  0x30   :  { %s82_s25 = sshll.u32 %s3948_s24, 4  ;;  %s94_s27 = sshll.u32 %s3949_s26, 4  ;;  %s83_s25 = int_to_ptr.vmem [resolvable:$true] %s82_s25  ;;  %s95_s27 = int_to_ptr.vmem [resolvable:$true] %s94_s27 }
  0x31   :  { %s3902_s0 = scalar_lea.vmem %s83_s25, 512  ;;  %p3907_p7 = scmp.lt.s32.totalorder %s83_s25, %s83_s25 }
  0x32   :  { %p3903_p6 = scmp.ne.s32.totalorder %s83_s25, %s3902_s0  ;;  %p3908_p8 = scmp.lt.s32.totalorder %s3902_s0, %s3902_s0 }
  0x34   :  { %p3909_p9 = por %p3908_p8, %p3907_p7 }
  0x36   :  { %p3910_p10 = pnand %p3909_p9, %p3903_p6 }
  0x38   :  { %3913 = shalt.err (!%p3910_p10)
}
  0x39   :  { %88 = dma.hbm_to_vmem [thread:$0]  %s4590_s7, 512, %s83_s25, [#allocation10], %s3944_s28, %s3944_s28, %s3945_s11  }
  0x3a   :  { %s3922_s4 = scalar_lea.vmem %s95_s27, 512  ;;  %p3927_p12 = scmp.lt.s32.totalorder %s95_s27, %s95_s27 }
  0x3b   :  { %p3923_p11 = scmp.ne.s32.totalorder %s95_s27, %s3922_s4  ;;  %p3928_p13 = scmp.lt.s32.totalorder %s3922_s4, %s3922_s4 }
  0x3d   :  { %p3929_p0 = por %p3928_p13, %p3927_p12 }
  0x3f   :  { %p3930_p1 = pnand %p3929_p0, %p3923_p11 }
  0x41   :  { %3933 = shalt.err (!%p3930_p1)
}
  0x42   :  { %100 = dma.hbm_to_vmem [thread:$0]  %s4591_s8, 512, %s95_s27, [#allocation13], %s3944_s28, %s3944_s28, %s3945_s11  }
  0x43   :  { %3934 = dma.done.wait [#allocation5], 256  }
  0x44   :  { %3935 = vsyncadd [#allocation5], 4294967040 }
  0x45   :  { %3936 = dma.done.wait [#allocation7], 768  }
  0x46   :  { %3937 = vsyncadd [#allocation7], 4294966528 }
  0x47   :  { %3938 = dma.done.wait [#allocation10], 1024  }
  0x48   :  { %3939 = vsyncadd [#allocation10], 4294966272 }
  0x49   :  { %3940 = dma.done.wait [#allocation13], 512  }
  0x4a   :  { %3941 = vsyncadd [#allocation13], 4294966784  ;;  %v3950_v1 = vmov 0.0   ;;  %vm3951_vm0 = vmmov 0   ;;  %v132_v2 = vld [vmem:[#allocation6 + $0x8] sm:$0xff]  ;;  %v4064_v3 = vld [vmem:[%s4585_s2 + $0x18] sm:$0xff] }
  0x4b   :  { %3309 = vmatprep.subr.mxu1 %v3950_v1  ;;  %3317 = vmatprep.mubr.msk.f32.mxu1 %vm3951_vm0, %v3950_v1  ;;  %v131_v4 = vld [vmem:[#allocation6] sm:$0xff]  ;;  %v4070_v5 = vld [vmem:[%s4585_s2 + $0x10] sm:$0xff]  ;;  %vm140_vm1 = vcmask 130048   ;;  %v126_v7 = vld [vmem:[#allocation4 + $0x8] sm:$0xff]  ;;  %s3952_s1 = smov 64   ;;  %vm325_vm2 = vcmask 254976  }
  0x4c   :  { %3302 = vmatprep.subr.mxu0 %v132_v2  ;;  %3310 = vmatpush3.msra.mxu1 %v4064_v3  ;;  %v125_v6 = vld [vmem:[#allocation4] sm:$0xff]  ;;  %v4077_v8 = vld [vmem:[%s4585_s2 + $0x8] sm:$0xff]  ;;  %v4083_v9 = vld [vmem:[%s4585_s2] sm:$0xff]  ;;  %vm222_vm3 = vcmask 261120   ;;  %vm434_vm4 = vcmask 257026   ;;  %vm658_vm5 = vcmask 261126  }
  0x4d   :  { %3303 = vmatpush3.msra.mxu0 %v132_v2  ;;  %3311 = vmatprep.subr.mxu1 %v3950_v1  ;;  %v3104_v10 = vld [vmem:[%s4586_s3] ss:$0 sm:$0xff]  ;;  %s3953_s3 = smov 32   ;;  %vm546_vm6 = vcmask 259076   ;;  %vm3094_vm7 = vcmask 1024  }
  0x4e   :  { %3304 = vmatprep.subr.mxu0 %v131_v4  ;;  %3312 = vmatpush3.msra.mxu1 %v4070_v5 }
  0x4f   :  { %3305 = vmatpush3.msra.mxu0 %v131_v4  ;;  %3306 = vmatprep.mubr.msk.f32.mxu0 %vm140_vm1, %v125_v6 }
  0x50   :  { %3313 = vmatprep.subr.mxu1 %v3950_v1  ;;  %3307 = vmatmul.mubr.msk.f32.vlgmr.msra.gmra.mxu0 %vm140_vm1, %v126_v7 }
  0x51   :  { %3314 = vmatpush3.msra.mxu1 %v4077_v8  ;;  %3320 = vmatprep.subr.mxu0 %v3950_v1 }
  0x52   :  { %3315 = vmatprep.subr.mxu1 %v3950_v1  ;;  %3321 = vmatpush3.msra.mxu0 %v4064_v3 }
  0x53   :  { %3316 = vmatpush3.msra.mxu1 %v4083_v9  ;;  %3322 = vmatprep.subr.mxu0 %v3950_v1 }
  0x54   :  { %3318 = vmatmul.mubr.f32.vlgmr.msra.gmra.mxu1 %v3950_v1  ;;  %3323 = vmatpush3.msra.mxu0 %v4070_v5 }
  0x55   :  { %3324 = vmatprep.subr.mxu0 %v3950_v1  ;;  %3328 = vmatprep.mubr.msk.f32.mxu0 %vm3951_vm0, %v3950_v1 }
  0x56   :  { %3325 = vmatpush3.msra.mxu0 %v4077_v8  ;;  %3331 = vmatprep.subr.mxu1 %v3950_v1 }
  0x57   :  { %3326 = vmatprep.subr.mxu0 %v3950_v1  ;;  %3332 = vmatpush3.msra.mxu1 %v4064_v3 }
  0x58   :  { %3327 = vmatpush3.msra.mxu0 %v4083_v9  ;;  %3333 = vmatprep.subr.mxu1 %v3950_v1 }
  0x59   :  { %3334 = vmatpush3.msra.mxu1 %v4070_v5  ;;  %3339 = vmatprep.mubr.msk.f32.mxu1 %vm3951_vm0, %v3950_v1 }
  0x5a   :  { %3335 = vmatprep.subr.mxu1 %v3950_v1  ;;  %3342 = vmatprep.subr.mxu0 %v3950_v1 }
  0x5b   :  { %3336 = vmatpush3.msra.mxu1 %v4077_v8 }
  0x5c   :  { %3337 = vmatprep.subr.mxu1 %v3950_v1 }
  0x5d   :  { %3338 = vmatpush3.msra.mxu1 %v4083_v9 }
  0x5e   :  { %3353 = vmatprep.subr.mxu1 %v3950_v1 }
 0x110   :  { %v3308_v11 = vpop.f32.mrf.mxu0 }
 0x111   :  { %v4114_v12 = vadd.f32 %v3308_v11, %v3104_v10 }
 0x112   :  { %v213_v13 = vpop.f32.mrf.mxu0 }
 0x113   :  { %v4116_v14 = vadd.f32 %v3104_v10, %v213_v13 }
 0x114   :  { %v292_v15 = vpop.f32.mrf.mxu1 }
 0x115   :  { %v296_v16 = vadd.f32 %v292_v15, %v4116_v14 }
 0x116   :  { %v3319_v17 = vpop.f32.mrf.mxu1 }
 0x117   :  { %3618 = vtanh.f32 %v296_v16  ;;  %v3107_v19 = vmul.f32 -1.442695, %v296_v16 }
 0x119   :  { %3620 = vpow2.f32 %v3107_v19 }
 0x124   :  { %v3619_v18 = vpop.eup %3618 }
 0x125   :  { %306 = vrot.lane.b32.xlu0 %v3619_v18, %s3952_s1 }
 0x126   :  { %v3621_v20 = vpop.eup %3620 }
 0x127   :  { %v300_v21 = vadd.f32 1.0, %v3621_v20 }
 0x129   :  { %3622 = vrcp.f32 %v300_v21 }
 0x136   :  { %v3623_v22 = vpop.eup %3622 }
 0x137   :  { %v304_v25 = vmul.f32 0.0, %v3623_v22 }
 0x197   :  { %v307_v23 = vpop.permute.xlu0 %306 }
 0x198   :  { %v309_v24 = vmul.f32 %v3623_v22, %v307_v23 }
 0x19a   :  { %311 = vrot.lane.b32.xlu0 %v309_v24, %s3953_s3 }
 0x20c   :  { %v312_v26 = vpop.permute.xlu0 %311 }
 0x20d   :  { %v314_v27 = vadd.f32 %v312_v26, %v304_v25 }
 0x20f   :  { %3624 = vtanh.f32 %v314_v27  ;;  %v411_v43 = vrot.slane %v314_v27, 6 }
 0x21c   :  { %v3625_v28 = vpop.eup %3624 }
 0x21d   :  { %317 = vrot.lane.b32.xlu1 %v3625_v28, %s3952_s1 }
 0x28f   :  { %v318_v29 = vpop.permute.xlu1 %317 }
 0x290   :  { %v320_v30 = vmul.f32 %v3623_v22, %v318_v29 }
 0x292   :  { %322 = vrot.lane.b32.xlu1 %v320_v30, %s3953_s3 }
 0x304   :  { %v323_v31 = vpop.permute.xlu1 %322 }
 0x305   :  { %326 = vst.msk [vmem:[#allocation2] sm:$0x3] %vm325_vm2, %v323_v31  ;;  %3329 = vmatmul.mubr.msk.f32.vlgmr.msra.gmra.mxu0 %vm222_vm3, %v323_v31 }
 0x306   :  { %3343 = vmatpush3.msra.mxu0 %v4064_v3  ;;  %3350 = vmatprep.mubr.msk.f32.mxu0 %vm3951_vm0, %v3950_v1 }
 0x307   :  { %3344 = vmatprep.subr.mxu0 %v3950_v1 }
 0x308   :  { %3345 = vmatpush3.msra.mxu0 %v4070_v5 }
 0x309   :  { %3346 = vmatprep.subr.mxu0 %v3950_v1 }
 0x30a   :  { %3347 = vmatpush3.msra.mxu0 %v4077_v8 }
 0x30b   :  { %3348 = vmatprep.subr.mxu0 %v3950_v1 }
 0x30c   :  { %3349 = vmatpush3.msra.mxu0 %v4083_v9 }
 0x30d   :  { %3364 = vmatprep.subr.mxu0 %v3950_v1 }
 0x3c5   :  { %v395_v32 = vpop.f32.mrf.mxu0 }
 0x3c6   :  { %v400_v33 = vrot.slane %v395_v32, 6 }
 0x3c7   :  { %v3330_v34 = vpop.f32.mrf.mxu0 }
 0x3c8   :  { %v402_v35 = vadd.f32 %v400_v33, %v4116_v14 }
 0x3ca   :  { %3626 = vtanh.f32 %v402_v35  ;;  %v3109_v37 = vmul.f32 -1.442695, %v402_v35 }
 0x3cc   :  { %3628 = vpow2.f32 %v3109_v37 }
 0x3d7   :  { %v3627_v36 = vpop.eup %3626 }
 0x3d8   :  { %415 = vrot.lane.b32.xlu0 %v3627_v36, %s3952_s1 }
 0x3d9   :  { %v3629_v38 = vpop.eup %3628 }
 0x3da   :  { %v406_v39 = vadd.f32 1.0, %v3629_v38 }
 0x3dc   :  { %3630 = vrcp.f32 %v406_v39 }
 0x3e9   :  { %v3631_v40 = vpop.eup %3630 }
 0x3ea   :  { %v413_v44 = vmul.f32 %v3631_v40, %v411_v43 }
 0x44a   :  { %v416_v41 = vpop.permute.xlu0 %415 }
 0x44b   :  { %v418_v42 = vmul.f32 %v3631_v40, %v416_v41 }
 0x44d   :  { %420 = vrot.lane.b32.xlu1 %v418_v42, %s3953_s3 }
 0x4bf   :  { %v421_v45 = vpop.permute.xlu1 %420 }
 0x4c0   :  { %v423_v46 = vadd.f32 %v421_v45, %v413_v44 }
 0x4c2   :  { %3632 = vtanh.f32 %v423_v46  ;;  %v523_v63 = vrot.slane %v423_v46, 6 }
 0x4cf   :  { %v3633_v47 = vpop.eup %3632 }
 0x4d0   :  { %426 = vrot.lane.b32.xlu0 %v3633_v47, %s3952_s1 }
 0x542   :  { %v427_v48 = vpop.permute.xlu0 %426 }
 0x543   :  { %v4139_v49 = vmul.f32 %v3631_v40, %v427_v48 }
 0x545   :  { %v436_v50 = vrot.slane %v4139_v49, 2 }
 0x547   :  { %437 = vrot.lane.b32.xlu1 %v436_v50, %s3953_s3 }
 0x5b9   :  { %v438_v51 = vpop.permute.xlu1 %437 }
 0x5ba   :  { %3340 = vmatmul.mubr.msk.f32.vlgmr.msra.gmra.mxu1 %vm222_vm3, %v438_v51 }
 0x5bb   :  { %3354 = vmatpush3.msra.mxu1 %v4064_v3  ;;  %3361 = vmatprep.mubr.msk.f32.mxu1 %vm3951_vm0, %v3950_v1 }
 0x5bc   :  { %3355 = vmatprep.subr.mxu1 %v3950_v1 }
 0x5bd   :  { %3356 = vmatpush3.msra.mxu1 %v4070_v5 }
 0x5be   :  { %3357 = vmatprep.subr.mxu1 %v3950_v1 }
 0x5bf   :  { %3358 = vmatpush3.msra.mxu1 %v4077_v8 }
 0x5c0   :  { %3359 = vmatprep.subr.mxu1 %v3950_v1 }
 0x5c1   :  { %3360 = vmatpush3.msra.mxu1 %v4083_v9 }
 0x5c2   :  { %3375 = vmatprep.subr.mxu1 %v3950_v1 }
 0x67a   :  { %v507_v52 = vpop.f32.mrf.mxu1 }
 0x67b   :  { %v512_v53 = vrot.slane %v507_v52, 4 }
 0x67c   :  { %v3341_v54 = vpop.f32.mrf.mxu1 }
 0x67d   :  { %v514_v55 = vadd.f32 %v512_v53, %v4116_v14 }
 0x67f   :  { %3634 = vtanh.f32 %v514_v55  ;;  %v3111_v57 = vmul.f32 -1.442695, %v514_v55 }
 0x681   :  { %3636 = vpow2.f32 %v3111_v57 }
 0x68c   :  { %v3635_v56 = vpop.eup %3634 }
 0x68d   :  { %527 = vrot.lane.b32.xlu0 %v3635_v56, %s3952_s1 }
 0x68e   :  { %v3637_v58 = vpop.eup %3636 }
 0x68f   :  { %v518_v59 = vadd.f32 1.0, %v3637_v58 }
 0x691   :  { %3638 = vrcp.f32 %v518_v59 }
 0x69e   :  { %v3639_v60 = vpop.eup %3638 }
 0x69f   :  { %v525_v0 = vmul.f32 %v3639_v60, %v523_v63 }
 0x6ff   :  { %v528_v61 = vpop.permute.xlu0 %527 }
 0x700   :  { %v530_v62 = vmul.f32 %v3639_v60, %v528_v61 }
 0x702   :  { %532 = vrot.lane.b32.xlu1 %v530_v62, %s3953_s3 }
 0x774   :  { %v533_v2 = vpop.permute.xlu1 %532 }
 0x775   :  { %v535_v4 = vadd.f32 %v533_v2, %v525_v0 }
 0x777   :  { %3640 = vtanh.f32 %v535_v4  ;;  %v635_v26 = vrot.slane %v535_v4, 6 }
 0x784   :  { %v3641_v6 = vpop.eup %3640 }
 0x785   :  { %538 = vrot.lane.b32.xlu0 %v3641_v6, %s3952_s1 }
 0x7f7   :  { %v539_v7 = vpop.permute.xlu0 %538 }
 0x7f8   :  { %v4158_v10 = vmul.f32 %v3639_v60, %v539_v7 }
 0x7fa   :  { %v548_v11 = vrot.slane %v4158_v10, 4 }
 0x7fc   :  { %549 = vrot.lane.b32.xlu1 %v548_v11, %s3953_s3 }
 0x86e   :  { %v550_v13 = vpop.permute.xlu1 %549 }
 0x86f   :  { %3351 = vmatmul.mubr.msk.f32.vlgmr.msra.gmra.mxu0 %vm222_vm3, %v550_v13 }
 0x870   :  { %3365 = vmatpush3.msra.mxu0 %v4064_v3  ;;  %3372 = vmatprep.mubr.msk.f32.mxu0 %vm3951_vm0, %v3950_v1 }
 0x871   :  { %3366 = vmatprep.subr.mxu0 %v3950_v1 }
 0x872   :  { %3367 = vmatpush3.msra.mxu0 %v4070_v5 }
 0x873   :  { %3368 = vmatprep.subr.mxu0 %v3950_v1 }
 0x874   :  { %3369 = vmatpush3.msra.mxu0 %v4077_v8 }
 0x875   :  { %3370 = vmatprep.subr.mxu0 %v3950_v1 }
 0x876   :  { %3371 = vmatpush3.msra.mxu0 %v4083_v9 }
 0x877   :  { %3386 = vmatprep.subr.mxu0 %v3950_v1 }
 0x92f   :  { %v619_v15 = vpop.f32.mrf.mxu0 }
 0x930   :  { %v624_v16 = vrot.slane %v619_v15, 2 }
 0x931   :  { %v3352_v17 = vpop.f32.mrf.mxu0 }
 0x932   :  { %v626_v18 = vadd.f32 %v624_v16, %v4116_v14 }
 0x934   :  { %3642 = vtanh.f32 %v626_v18  ;;  %v3113_v20 = vmul.f32 -1.442695, %v626_v18 }
 0x936   :  { %3644 = vpow2.f32 %v3113_v20 }
 0x941   :  { %v3643_v19 = vpop.eup %3642 }
 0x942   :  { %639 = vrot.lane.b32.xlu0 %v3643_v19, %s3952_s1 }
 0x943   :  { %v3645_v21 = vpop.eup %3644 }
 0x944   :  { %v630_v22 = vadd.f32 1.0, %v3645_v21 }
 0x946   :  { %3646 = vrcp.f32 %v630_v22 }
 0x953   :  { %v3647_v23 = vpop.eup %3646 }
 0x954   :  { %v637_v27 = vmul.f32 %v3647_v23, %v635_v26 }
 0x9b4   :  { %v640_v24 = vpop.permute.xlu0 %639 }
 0x9b5   :  { %v642_v25 = vmul.f32 %v3647_v23, %v640_v24 }
 0x9b7   :  { %644 = vrot.lane.b32.xlu1 %v642_v25, %s3953_s3 }
 0xa29   :  { %v645_v28 = vpop.permute.xlu1 %644 }
 0xa2a   :  { %v647_v29 = vadd.f32 %v645_v28, %v637_v27 }
 0xa2c   :  { %3648 = vtanh.f32 %v647_v29  ;;  %v744_v44 = vrot.slane %v647_v29, 6 }
 0xa39   :  { %v3649_v14 = vpop.eup %3648 }
 0xa3a   :  { %650 = vrot.lane.b32.xlu0 %v3649_v14, %s3952_s1 }
 0xaac   :  { %v651_v30 = vpop.permute.xlu0 %650 }
 0xaad   :  { %v4177_v31 = vmul.f32 %v3647_v23, %v651_v30 }
 0xaaf   :  { %v660_v32 = vrot.slane %v4177_v31, 6 }
 0xab1   :  { %661 = vrot.lane.b32.xlu1 %v660_v32, %s3953_s3 }
 0xb23   :  { %v662_v33 = vpop.permute.xlu1 %661 }
 0xb24   :  { %3362 = vmatmul.mubr.msk.f32.vlgmr.msra.gmra.mxu1 %vm222_vm3, %v662_v33 }
 0xb25   :  { %3376 = vmatpush3.msra.mxu1 %v4064_v3  ;;  %3383 = vmatprep.mubr.msk.f32.mxu1 %vm3951_vm0, %v3950_v1 }
 0xb26   :  { %3377 = vmatprep.subr.mxu1 %v3950_v1 }
 0xb27   :  { %3378 = vmatpush3.msra.mxu1 %v4070_v5 }
 0xb28   :  { %3379 = vmatprep.subr.mxu1 %v3950_v1 }
 0xb29   :  { %3380 = vmatpush3.msra.mxu1 %v4077_v8 }
 0xb2a   :  { %3381 = vmatprep.subr.mxu1 %v3950_v1 }
 0xb2b   :  { %3382 = vmatpush3.msra.mxu1 %v4083_v9 }
 0xbe4   :  { %v731_v34 = vpop.f32.mrf.mxu1 }
 0xbe5   :  { %v735_v35 = vadd.f32 %v731_v34, %v4114_v12 }
 0xbe6   :  { %v3363_v36 = vpop.f32.mrf.mxu1 }
 0xbe7   :  { %3650 = vtanh.f32 %v735_v35  ;;  %v3115_v38 = vmul.f32 -1.442695, %v735_v35 }
 0xbe9   :  { %3652 = vpow2.f32 %v3115_v38 }
 0xbf4   :  { %v3651_v37 = vpop.eup %3650 }
 0xbf5   :  { %748 = vrot.lane.b32.xlu0 %v3651_v37, %s3952_s1 }
 0xbf6   :  { %v3653_v39 = vpop.eup %3652 }
 0xbf7   :  { %v739_v40 = vadd.f32 1.0, %v3653_v39 }
 0xbf9   :  { %3654 = vrcp.f32 %v739_v40 }
 0xc06   :  { %v3655_v41 = vpop.eup %3654 }
 0xc07   :  { %v746_v45 = vmul.f32 %v3655_v41, %v744_v44 }
 0xc67   :  { %v749_v42 = vpop.permute.xlu0 %748 }
 0xc68   :  { %v751_v43 = vmul.f32 %v3655_v41, %v749_v42 }
 0xc6a   :  { %753 = vrot.lane.b32.xlu1 %v751_v43, %s3953_s3 }
 0xcdc   :  { %v754_v46 = vpop.permute.xlu1 %753 }
 0xcdd   :  { %v756_v47 = vadd.f32 %v754_v46, %v746_v45 }
 0xcdf   :  { %3656 = vtanh.f32 %v756_v47 }
 0xcec   :  { %v3657_v48 = vpop.eup %3656 }
 0xced   :  { %759 = vrot.lane.b32.xlu0 %v3657_v48, %s3952_s1 }
 0xd5f   :  { %v760_v50 = vpop.permute.xlu0 %759 }
 0xd60   :  { %v762_v51 = vmul.f32 %v3655_v41, %v760_v50  ;;  %v1107_v50 = vld [vmem:[#allocation8 + $0x18] sm:$0xff] }
 0xd61   :  { %3397 = vmatprep.subr.mxu1 %v1107_v50 }
 0xd62   :  { %764 = vrot.lane.b32.xlu1 %v762_v51, %s3953_s3  ;;  %v1106_v51 = vld [vmem:[#allocation8 + $0x10] sm:$0xff] }
 0xdd4   :  { %v765_v52 = vpop.permute.xlu1 %764 }
 0xdd5   :  { %767 = vst.msk [vmem:[#allocation2 + $0x8] sm:$0x3] %vm325_vm2, %v765_v52  ;;  %3373 = vmatmul.mubr.msk.f32.vlgmr.msra.gmra.mxu0 %vm222_vm3, %v765_v52  ;;  %v4241_v52 = vld [vmem:[#allocation9 + $0x18] sm:$0xff] }
 0xdd6   :  { %3387 = vmatpush3.msra.mxu0 %v4064_v3  ;;  %3394 = vmatprep.mubr.msk.f32.mxu0 %vm3951_vm0, %v3950_v1 }
 0xdd7   :  { %3388 = vmatprep.subr.mxu0 %v3950_v1 }
 0xdd8   :  { %3389 = vmatpush3.msra.mxu0 %v4070_v5 }
 0xdd9   :  { %3390 = vmatprep.subr.mxu0 %v3950_v1 }
 0xdda   :  { %3391 = vmatpush3.msra.mxu0 %v4077_v8 }
 0xddb   :  { %3392 = vmatprep.subr.mxu0 %v3950_v1 }
 0xddc   :  { %3393 = vmatpush3.msra.mxu0 %v4083_v9  ;;  %v852_v9 = vrot.slane %v756_v47, 6 }
 0xddd   :  { %3408 = vmatprep.subr.mxu0 %v3950_v1 }
 0xe95   :  { %v836_v53 = vpop.f32.mrf.mxu0 }
 0xe96   :  { %v841_v54 = vrot.slane %v836_v53, 6  ;;  %v4244_v53 = vld [vmem:[#allocation9 + $0x10] sm:$0xff] }
 0xe97   :  { %v3374_v3 = vpop.f32.mrf.mxu0 }
 0xe98   :  { %v843_v55 = vadd.f32 %v841_v54, %v4114_v12  ;;  %v1105_v54 = vld [vmem:[#allocation8 + $0x8] sm:$0xff] }
 0xe99   :  { %v4247_v3 = vld [vmem:[#allocation9 + $0x8] sm:$0xff] }
 0xe9a   :  { %3658 = vtanh.f32 %v843_v55  ;;  %v3117_v5 = vmul.f32 -1.442695, %v843_v55  ;;  %v4253_v55 = vld [vmem:[#allocation9] sm:$0xff] }
 0xe9c   :  { %3660 = vpow2.f32 %v3117_v5 }
 0xea7   :  { %v3659_v56 = vpop.eup %3658 }
 0xea8   :  { %856 = vrot.lane.b32.xlu0 %v3659_v56, %s3952_s1 }
 0xea9   :  { %v3661_v57 = vpop.eup %3660 }
 0xeaa   :  { %v847_v58 = vadd.f32 1.0, %v3661_v57 }
 0xeac   :  { %3662 = vrcp.f32 %v847_v58 }
 0xeb9   :  { %v3663_v8 = vpop.eup %3662 }
 0xeba   :  { %v854_v61 = vmul.f32 %v3663_v8, %v852_v9 }
 0xf1a   :  { %v857_v59 = vpop.permute.xlu0 %856 }
 0xf1b   :  { %v859_v60 = vmul.f32 %v3663_v8, %v857_v59 }
 0xf1d   :  { %861 = vrot.lane.b32.xlu1 %v859_v60, %s3953_s3 }
 0xf8f   :  { %v862_v62 = vpop.permute.xlu1 %861 }
 0xf90   :  { %v864_v63 = vadd.f32 %v862_v62, %v854_v61  ;;  %v3122_v62 = vld [vmem:[%s4589_s6] ss:$0 sm:$0xff] }
 0xf92   :  { %3664 = vtanh.f32 %v864_v63  ;;  %v963_v24 = vrot.slane %v864_v63, 6 }
 0xf9f   :  { %v3665_v0 = vpop.eup %3664 }
 0xfa0   :  { %867 = vrot.lane.b32.xlu0 %v3665_v0, %s3952_s1 }
0x1012   :  { %v868_v2 = vpop.permute.xlu0 %867 }
0x1013   :  { %v4212_v4 = vmul.f32 %v3663_v8, %v868_v2 }
0x1015   :  { %v876_v6 = vrot.slane %v4212_v4, 2 }
0x1017   :  { %877 = vrot.lane.b32.xlu1 %v876_v6, %s3953_s3 }
0x1089   :  { %v878_v7 = vpop.permute.xlu1 %877 }
0x108a   :  { %3384 = vmatmul.mubr.msk.f32.vlgmr.msra.gmra.mxu1 %vm222_vm3, %v878_v7 }
0x108b   :  { %3398 = vmatpush3.msra.mxu1 %v1107_v50 }
0x108c   :  { %3399 = vmatprep.subr.mxu1 %v1106_v51 }
0x108d   :  { %3400 = vmatpush3.msra.mxu1 %v1106_v51 }
0x108e   :  { %3401 = vmatprep.subr.mxu1 %v1105_v54 }
0x108f   :  { %3402 = vmatpush3.msra.mxu1 %v1105_v54 }
0x114a   :  { %v947_v11 = vpop.f32.mrf.mxu1 }
0x114b   :  { %v952_v13 = vrot.slane %v947_v11, 4 }
0x114c   :  { %v3385_v15 = vpop.f32.mrf.mxu1 }
0x114d   :  { %v954_v16 = vadd.f32 %v952_v13, %v4114_v12 }
0x114f   :  { %3666 = vtanh.f32 %v954_v16  ;;  %v3119_v18 = vmul.f32 -1.442695, %v954_v16 }
0x1151   :  { %3668 = vpow2.f32 %v3119_v18 }
0x115c   :  { %v3667_v17 = vpop.eup %3666 }
0x115d   :  { %967 = vrot.lane.b32.xlu0 %v3667_v17, %s3952_s1 }
0x115e   :  { %v3669_v19 = vpop.eup %3668 }
0x115f   :  { %v958_v20 = vadd.f32 1.0, %v3669_v19 }
0x1161   :  { %3670 = vrcp.f32 %v958_v20 }
0x116e   :  { %v3671_v21 = vpop.eup %3670 }
0x116f   :  { %v965_v25 = vmul.f32 %v3671_v21, %v963_v24 }
0x11cf   :  { %v968_v22 = vpop.permute.xlu0 %967 }
0x11d0   :  { %v970_v23 = vmul.f32 %v3671_v21, %v968_v22 }
0x11d2   :  { %972 = vrot.lane.b32.xlu1 %v970_v23, %s3953_s3 }
0x1244   :  { %v973_v26 = vpop.permute.xlu1 %972 }
0x1245   :  { %v975_v27 = vadd.f32 %v973_v26, %v965_v25 }
0x1247   :  { %3672 = vtanh.f32 %v975_v27 }
0x1254   :  { %v3673_v28 = vpop.eup %3672 }
0x1255   :  { %978 = vrot.lane.b32.xlu0 %v3673_v28, %s3952_s1 }
0x12c7   :  { %v979_v29 = vpop.permute.xlu0 %978 }
0x12c8   :  { %v981_v14 = vmul.f32 %v3671_v21, %v979_v29 }
0x12ca   :  { %v987_v30 = vrot.slane %v981_v14, 4 }
0x12cc   :  { %988 = vrot.lane.b32.xlu1 %v987_v30, %s3953_s3 }
0x133e   :  { %v989_v32 = vpop.permute.xlu1 %988 }
0x133f   :  { %3395 = vmatmul.mubr.msk.f32.vlgmr.msra.gmra.mxu0 %vm222_vm3, %v989_v32 }
0x1340   :  { %3416 = vmatprep.mubr.msk.f32.mxu0 %vm3951_vm0, %v3950_v1  ;;  %3409 = vmatpush3.msra.mxu0 %v4241_v52 }
0x1341   :  { %3410 = vmatprep.subr.mxu0 %v3950_v1 }
0x1342   :  { %3411 = vmatpush3.msra.mxu0 %v4244_v53 }
0x1343   :  { %3412 = vmatprep.subr.mxu0 %v3950_v1 }
0x1344   :  { %3413 = vmatpush3.msra.mxu0 %v4247_v3 }
0x1345   :  { %3414 = vmatprep.subr.mxu0 %v3950_v1 }
0x1346   :  { %3415 = vmatpush3.msra.mxu0 %v4253_v55 }
0x1347   :  { %3417 = vmatmul.mubr.f32.vlgmr.msra.gmra.mxu0 %v3950_v1  ;;  %3430 = vmatprep.subr.mxu0 %v3950_v1 }
0x1348   :  { %3431 = vmatpush3.msra.mxu0 %v4241_v52  ;;  %3438 = vmatprep.mubr.msk.f32.mxu0 %vm3951_vm0, %v3950_v1 }
0x1349   :  { %3432 = vmatprep.subr.mxu0 %v3950_v1 }
0x134a   :  { %3433 = vmatpush3.msra.mxu0 %v4244_v53 }
0x134b   :  { %3434 = vmatprep.subr.mxu0 %v3950_v1 }
0x134c   :  { %3435 = vmatpush3.msra.mxu0 %v4247_v3 }
0x134d   :  { %3436 = vmatprep.subr.mxu0 %v3950_v1 }
0x134e   :  { %3437 = vmatpush3.msra.mxu0 %v4253_v55 }
0x134f   :  { %3452 = vmatprep.subr.mxu0 %v3950_v1 }
0x13ff   :  { %v1058_v33 = vpop.f32.mrf.mxu0 }
0x1400   :  { %v1063_v34 = vrot.slane %v1058_v33, 2 }
0x1401   :  { %v3396_v35 = vpop.f32.mrf.mxu0 }
0x1402   :  { %v1065_v36 = vadd.f32 %v1063_v34, %v4114_v12  ;;  %v1074_v12 = vrot.slane %v975_v27, 6 }
0x1404   :  { %3674 = vtanh.f32 %v1065_v36  ;;  %v3121_v38 = vmul.f32 -1.442695, %v1065_v36 }
0x1406   :  { %3676 = vpow2.f32 %v3121_v38 }
0x1407   :  { %v1262_v9 = vpop.f32.mrf.mxu0 }
0x1409   :  { %v3418_v61 = vpop.f32.mrf.mxu0 }
0x1411   :  { %v3675_v37 = vpop.eup %3674 }
0x1412   :  { %1078 = vrot.lane.b32.xlu0 %v3675_v37, %s3952_s1 }
0x1413   :  { %v3677_v39 = vpop.eup %3676 }
0x1414   :  { %v1069_v40 = vadd.f32 1.0, %v3677_v39 }
0x1416   :  { %3678 = vrcp.f32 %v1069_v40 }
0x1423   :  { %v3679_v41 = vpop.eup %3678 }
0x1424   :  { %v1076_v44 = vmul.f32 %v3679_v41, %v1074_v12 }
0x1484   :  { %v1079_v42 = vpop.permute.xlu0 %1078 }
0x1485   :  { %v1081_v43 = vmul.f32 %v3679_v41, %v1079_v42 }
0x1487   :  { %1083 = vrot.lane.b32.xlu1 %v1081_v43, %s3953_s3 }
0x148b   :  { %431 = vrot.lane.b32.xlu1 %v4139_v49, %s3953_s3 }
0x148f   :  { %655 = vrot.lane.b32.xlu1 %v4177_v31, %s3953_s3 }
0x1493   :  { %983 = vrot.lane.b32.xlu1 %v981_v14, %s3953_s3 }
0x14f9   :  { %v1084_v45 = vpop.permute.xlu1 %1083 }
0x14fa   :  { %v1086_v46 = vadd.f32 %v1084_v45, %v1076_v44 }
0x14fc   :  { %3680 = vtanh.f32 %v1086_v46 }
0x14fd   :  { %v432_v47 = vpop.permute.xlu1 %431 }
0x14fe   :  { %435 = vst.msk [vmem:[#allocation2] sm:$0xc] %vm434_vm4, %v432_v47 }
0x1501   :  { %v656_v48 = vpop.permute.xlu1 %655 }
0x1502   :  { %659 = vst.msk [vmem:[#allocation2] sm:$0xc0] %vm658_vm5, %v656_v48 }
0x1505   :  { %v984_v49 = vpop.permute.xlu1 %983 }
0x1506   :  { %986 = vst.msk [vmem:[#allocation2 + $0x8] sm:$0x30] %vm546_vm6, %v984_v49 }
0x1509   :  { %v3681_v31 = vpop.eup %3680 }
0x150a   :  { %1089 = vrot.lane.b32.xlu0 %v3681_v31, %s3952_s1 }
0x150e   :  { %543 = vrot.lane.b32.xlu0 %v4158_v10, %s3953_s3  ;;  %v1104_v10 = vld [vmem:[#allocation8] sm:$0xff] }
0x150f   :  { %3403 = vmatprep.subr.mxu1 %v1104_v10 }
0x1510   :  { %3404 = vmatpush3.msra.mxu1 %v1104_v10 }
0x1511   :  { %3419 = vmatprep.subr.mxu1 %v3950_v1 }
0x1512   :  { %872 = vrot.lane.b32.xlu0 %v4212_v4, %s3953_s3 }
0x157c   :  { %v1090_v56 = vpop.permute.xlu0 %1089 }
0x157d   :  { %v1092_v5 = vmul.f32 %v3679_v41, %v1090_v56 }
0x157f   :  { %1094 = vrot.lane.b32.xlu0 %v1092_v5, %s3953_s3 }
0x1580   :  { %v544_v57 = vpop.permute.xlu0 %543 }
0x1581   :  { %547 = vst.msk [vmem:[#allocation2] sm:$0x30] %vm546_vm6, %v544_v57 }
0x1584   :  { %v873_v58 = vpop.permute.xlu0 %872 }
0x1585   :  { %875 = vst.msk [vmem:[#allocation2 + $0x8] sm:$0xc] %vm434_vm4, %v873_v58 }
0x1588   :  { %v1098_v8 = vld [vmem:[#allocation2] sm:$0xff] }
0x1589   :  { %3405 = vmatprep.mubr.msk.f32.mxu1 %vm222_vm3, %v1098_v8 }
0x15f1   :  { %v1095_v59 = vpop.permute.xlu0 %1094 }
0x15f2   :  { %1097 = vst.msk [vmem:[#allocation2 + $0x8] sm:$0xc0] %vm658_vm5, %v1095_v59 }
0x15f9   :  { %v1099_v60 = vld [vmem:[#allocation2 + $0x8] sm:$0xff] }
0x15fa   :  { %3406 = vmatmul.mubr.msk.f32.vlgmr.msra.gmra.mxu1 %vm222_vm3, %v1099_v60 }
0x15fb   :  { %3420 = vmatpush3.msra.mxu1 %v4241_v52  ;;  %3427 = vmatprep.mubr.msk.f32.mxu1 %vm3951_vm0, %v3950_v1 }
0x15fc   :  { %3421 = vmatprep.subr.mxu1 %v3950_v1 }
0x15fd   :  { %3422 = vmatpush3.msra.mxu1 %v4244_v53 }
0x15fe   :  { %3423 = vmatprep.subr.mxu1 %v3950_v1 }
0x15ff   :  { %3424 = vmatpush3.msra.mxu1 %v4247_v3 }
0x1600   :  { %3425 = vmatprep.subr.mxu1 %v3950_v1 }
0x1601   :  { %3426 = vmatpush3.msra.mxu1 %v4253_v55 }
0x1602   :  { %3441 = vmatprep.subr.mxu1 %v3950_v1 }
0x16ba   :  { %v3407_v63 = vpop.f32.mrf.mxu1 }
0x16bb   :  { %v4288_v0 = vadd.f32 %v3407_v63, %v3122_v62 }
0x16bc   :  { %v1187_v2 = vpop.f32.mrf.mxu1 }
0x16bd   :  { %v4290_v4 = vadd.f32 %v3122_v62, %v1187_v2 }
0x16bf   :  { %v1266_v6 = vadd.f32 %v1262_v9, %v4290_v4 }
0x16c1   :  { %3682 = vtanh.f32 %v1266_v6  ;;  %v3125_v11 = vmul.f32 -1.442695, %v1266_v6 }
0x16c3   :  { %3684 = vpow2.f32 %v3125_v11 }
0x16ce   :  { %v3683_v7 = vpop.eup %3682 }
0x16cf   :  { %1276 = vrot.lane.b32.xlu1 %v3683_v7, %s3952_s1 }
0x16d0   :  { %v3685_v13 = vpop.eup %3684 }
0x16d1   :  { %v1270_v15 = vadd.f32 1.0, %v3685_v13 }
0x16d3   :  { %3686 = vrcp.f32 %v1270_v15 }
0x16e0   :  { %v3687_v16 = vpop.eup %3686 }
0x16e1   :  { %v1274_v19 = vmul.f32 0.0, %v3687_v16 }
0x1741   :  { %v1277_v17 = vpop.permute.xlu1 %1276 }
0x1742   :  { %v1279_v18 = vmul.f32 %v3687_v16, %v1277_v17 }
0x1744   :  { %1281 = vrot.lane.b32.xlu0 %v1279_v18, %s3953_s3 }
0x17b6   :  { %v1282_v20 = vpop.permute.xlu0 %1281 }
0x17b7   :  { %v1284_v21 = vadd.f32 %v1282_v20, %v1274_v19 }
0x17b9   :  { %3688 = vtanh.f32 %v1284_v21  ;;  %v1380_v37 = vrot.slane %v1284_v21, 6 }
0x17c6   :  { %v3689_v22 = vpop.eup %3688 }
0x17c7   :  { %1287 = vrot.lane.b32.xlu1 %v3689_v22, %s3952_s1 }
0x1839   :  { %v1288_v23 = vpop.permute.xlu1 %1287 }
0x183a   :  { %v1290_v24 = vmul.f32 %v3687_v16, %v1288_v23 }
0x183c   :  { %1292 = vrot.lane.b32.xlu0 %v1290_v24, %s3953_s3 }
0x18ae   :  { %v1293_v25 = vpop.permute.xlu0 %1292 }
0x18af   :  { %1295 = vst.msk [vmem:[#allocation2] sm:$0x3] %vm325_vm2, %v1293_v25  ;;  %3428 = vmatmul.mubr.msk.f32.vlgmr.msra.gmra.mxu1 %vm222_vm3, %v1293_v25 }
0x18b0   :  { %3442 = vmatpush3.msra.mxu1 %v4241_v52  ;;  %3449 = vmatprep.mubr.msk.f32.mxu1 %vm3951_vm0, %v3950_v1 }
0x18b1   :  { %3443 = vmatprep.subr.mxu1 %v3950_v1 }
0x18b2   :  { %3444 = vmatpush3.msra.mxu1 %v4244_v53 }
0x18b3   :  { %3445 = vmatprep.subr.mxu1 %v3950_v1 }
0x18b4   :  { %3446 = vmatpush3.msra.mxu1 %v4247_v3 }
0x18b5   :  { %3447 = vmatprep.subr.mxu1 %v3950_v1 }
0x18b6   :  { %3448 = vmatpush3.msra.mxu1 %v4253_v55 }
0x18b7   :  { %3463 = vmatprep.subr.mxu1 %v3950_v1 }
0x196f   :  { %v1364_v26 = vpop.f32.mrf.mxu1 }
0x1970   :  { %v1369_v27 = vrot.slane %v1364_v26, 6 }
0x1971   :  { %v3429_v28 = vpop.f32.mrf.mxu1 }
0x1972   :  { %v1371_v29 = vadd.f32 %v1369_v27, %v4290_v4 }
0x1974   :  { %3690 = vtanh.f32 %v1371_v29  ;;  %v3127_v30 = vmul.f32 -1.442695, %v1371_v29 }
0x1976   :  { %3692 = vpow2.f32 %v3127_v30 }
0x1981   :  { %v3691_v14 = vpop.eup %3690 }
0x1982   :  { %1384 = vrot.lane.b32.xlu1 %v3691_v14, %s3952_s1 }
0x1983   :  { %v3693_v32 = vpop.eup %3692 }
0x1984   :  { %v1375_v33 = vadd.f32 1.0, %v3693_v32 }
0x1986   :  { %3694 = vrcp.f32 %v1375_v33 }
0x1993   :  { %v3695_v34 = vpop.eup %3694 }
0x1994   :  { %v1382_v38 = vmul.f32 %v3695_v34, %v1380_v37 }
0x19f4   :  { %v1385_v35 = vpop.permute.xlu1 %1384 }
0x19f5   :  { %v1387_v36 = vmul.f32 %v3695_v34, %v1385_v35 }
0x19f7   :  { %1389 = vrot.lane.b32.xlu0 %v1387_v36, %s3953_s3 }
0x1a69   :  { %v1390_v39 = vpop.permute.xlu0 %1389 }
0x1a6a   :  { %v1392_v40 = vadd.f32 %v1390_v39, %v1382_v38 }
0x1a6c   :  { %3696 = vtanh.f32 %v1392_v40  ;;  %v1491_v5 = vrot.slane %v1392_v40, 6 }
0x1a79   :  { %v3697_v41 = vpop.eup %3696 }
0x1a7a   :  { %1395 = vrot.lane.b32.xlu1 %v3697_v41, %s3952_s1 }
0x1aec   :  { %v1396_v42 = vpop.permute.xlu1 %1395 }
0x1aed   :  { %v4313_v43 = vmul.f32 %v3695_v34, %v1396_v42 }
0x1aef   :  { %v1404_v12 = vrot.slane %v4313_v43, 2 }
0x1af1   :  { %1405 = vrot.lane.b32.xlu0 %v1404_v12, %s3953_s3 }
0x1b63   :  { %v1406_v44 = vpop.permute.xlu0 %1405 }
0x1b64   :  { %3439 = vmatmul.mubr.msk.f32.vlgmr.msra.gmra.mxu0 %vm222_vm3, %v1406_v44 }
0x1b65   :  { %3453 = vmatpush3.msra.mxu0 %v4241_v52  ;;  %3460 = vmatprep.mubr.msk.f32.mxu0 %vm3951_vm0, %v3950_v1 }
0x1b66   :  { %3454 = vmatprep.subr.mxu0 %v3950_v1 }
0x1b67   :  { %3455 = vmatpush3.msra.mxu0 %v4244_v53 }
0x1b68   :  { %3456 = vmatprep.subr.mxu0 %v3950_v1 }
0x1b69   :  { %3457 = vmatpush3.msra.mxu0 %v4247_v3 }
0x1b6a   :  { %3458 = vmatprep.subr.mxu0 %v3950_v1 }
0x1b6b   :  { %3459 = vmatpush3.msra.mxu0 %v4253_v55 }
0x1b6c   :  { %3474 = vmatprep.subr.mxu0 %v3950_v1 }
0x1c24   :  { %v1475_v45 = vpop.f32.mrf.mxu0 }
0x1c25   :  { %v1480_v46 = vrot.slane %v1475_v45, 4 }
0x1c26   :  { %v3440_v47 = vpop.f32.mrf.mxu0 }
0x1c27   :  { %v1482_v48 = vadd.f32 %v1480_v46, %v4290_v4 }
0x1c29   :  { %3698 = vtanh.f32 %v1482_v48  ;;  %v3129_v31 = vmul.f32 -1.442695, %v1482_v48 }
0x1c2b   :  { %3700 = vpow2.f32 %v3129_v31 }
0x1c36   :  { %v3699_v49 = vpop.eup %3698 }
0x1c37   :  { %1495 = vrot.lane.b32.xlu1 %v3699_v49, %s3952_s1 }
0x1c38   :  { %v3701_v50 = vpop.eup %3700 }
0x1c39   :  { %v1486_v51 = vadd.f32 1.0, %v3701_v50 }
0x1c3b   :  { %3702 = vrcp.f32 %v1486_v51 }
0x1c48   :  { %v3703_v54 = vpop.eup %3702 }
0x1c49   :  { %v1493_v57 = vmul.f32 %v3703_v54, %v1491_v5 }
0x1ca9   :  { %v1496_v10 = vpop.permute.xlu1 %1495 }
0x1caa   :  { %v1498_v56 = vmul.f32 %v3703_v54, %v1496_v10 }
0x1cac   :  { %1500 = vrot.lane.b32.xlu0 %v1498_v56, %s3953_s3 }
0x1d1e   :  { %v1501_v58 = vpop.permute.xlu0 %1500 }
0x1d1f   :  { %v1503_v8 = vadd.f32 %v1501_v58, %v1493_v57 }
0x1d21   :  { %3704 = vtanh.f32 %v1503_v8  ;;  %v1602_v20 = vrot.slane %v1503_v8, 6 }
0x1d2e   :  { %v3705_v59 = vpop.eup %3704 }
0x1d2f   :  { %1506 = vrot.lane.b32.xlu1 %v3705_v59, %s3952_s1 }
0x1da1   :  { %v1507_v60 = vpop.permute.xlu1 %1506 }
0x1da2   :  { %v4332_v9 = vmul.f32 %v3703_v54, %v1507_v60 }
0x1da4   :  { %v1515_v61 = vrot.slane %v4332_v9, 4 }
0x1da6   :  { %1516 = vrot.lane.b32.xlu0 %v1515_v61, %s3953_s3 }
0x1e18   :  { %v1517_v62 = vpop.permute.xlu0 %1516 }
0x1e19   :  { %3450 = vmatmul.mubr.msk.f32.vlgmr.msra.gmra.mxu1 %vm222_vm3, %v1517_v62 }
0x1e1a   :  { %3464 = vmatpush3.msra.mxu1 %v4241_v52  ;;  %3471 = vmatprep.mubr.msk.f32.mxu1 %vm3951_vm0, %v3950_v1 }
0x1e1b   :  { %3465 = vmatprep.subr.mxu1 %v3950_v1 }
0x1e1c   :  { %3466 = vmatpush3.msra.mxu1 %v4244_v53 }
0x1e1d   :  { %3467 = vmatprep.subr.mxu1 %v3950_v1 }
0x1e1e   :  { %3468 = vmatpush3.msra.mxu1 %v4247_v3 }
0x1e1f   :  { %3469 = vmatprep.subr.mxu1 %v3950_v1 }
0x1e20   :  { %3470 = vmatpush3.msra.mxu1 %v4253_v55 }
0x1e21   :  { %3485 = vmatprep.subr.mxu1 %v3950_v1 }
0x1ed9   :  { %v1586_v63 = vpop.f32.mrf.mxu1 }
0x1eda   :  { %v1591_v2 = vrot.slane %v1586_v63, 2 }
0x1edb   :  { %v3451_v6 = vpop.f32.mrf.mxu1 }
0x1edc   :  { %v1593_v7 = vadd.f32 %v1591_v2, %v4290_v4 }
0x1ede   :  { %3706 = vtanh.f32 %v1593_v7  ;;  %v3131_v13 = vmul.f32 -1.442695, %v1593_v7 }
0x1ee0   :  { %3708 = vpow2.f32 %v3131_v13 }
0x1eeb   :  { %v3707_v11 = vpop.eup %3706 }
0x1eec   :  { %1606 = vrot.lane.b32.xlu1 %v3707_v11, %s3952_s1 }
0x1eed   :  { %v3709_v15 = vpop.eup %3708 }
0x1eee   :  { %v1597_v16 = vadd.f32 1.0, %v3709_v15 }
0x1ef0   :  { %3710 = vrcp.f32 %v1597_v16 }
0x1efd   :  { %v3711_v17 = vpop.eup %3710 }
0x1efe   :  { %v1604_v21 = vmul.f32 %v3711_v17, %v1602_v20 }
0x1f5e   :  { %v1607_v18 = vpop.permute.xlu1 %1606 }
0x1f5f   :  { %v1609_v19 = vmul.f32 %v3711_v17, %v1607_v18 }
0x1f61   :  { %1611 = vrot.lane.b32.xlu0 %v1609_v19, %s3953_s3 }
0x1fd3   :  { %v1612_v22 = vpop.permute.xlu0 %1611 }
0x1fd4   :  { %v1614_v23 = vadd.f32 %v1612_v22, %v1604_v21 }
0x1fd6   :  { %3712 = vtanh.f32 %v1614_v23  ;;  %v1710_v38 = vrot.slane %v1614_v23, 6 }
0x1fe3   :  { %v3713_v4 = vpop.eup %3712 }
0x1fe4   :  { %1617 = vrot.lane.b32.xlu1 %v3713_v4, %s3952_s1 }
0x2056   :  { %v1618_v24 = vpop.permute.xlu1 %1617 }
0x2057   :  { %v4351_v25 = vmul.f32 %v3711_v17, %v1618_v24 }
0x2059   :  { %v1626_v26 = vrot.slane %v4351_v25, 6 }
0x205b   :  { %1627 = vrot.lane.b32.xlu0 %v1626_v26, %s3953_s3 }
0x20cd   :  { %v1628_v27 = vpop.permute.xlu0 %1627 }
0x20ce   :  { %3461 = vmatmul.mubr.msk.f32.vlgmr.msra.gmra.mxu0 %vm222_vm3, %v1628_v27 }
0x20cf   :  { %3475 = vmatpush3.msra.mxu0 %v4241_v52  ;;  %3482 = vmatprep.mubr.msk.f32.mxu0 %vm3951_vm0, %v3950_v1 }
0x20d0   :  { %3476 = vmatprep.subr.mxu0 %v3950_v1 }
0x20d1   :  { %3477 = vmatpush3.msra.mxu0 %v4244_v53 }
0x20d2   :  { %3478 = vmatprep.subr.mxu0 %v3950_v1 }
0x20d3   :  { %3479 = vmatpush3.msra.mxu0 %v4247_v3 }
0x20d4   :  { %3480 = vmatprep.subr.mxu0 %v3950_v1 }
0x20d5   :  { %3481 = vmatpush3.msra.mxu0 %v4253_v55 }
0x218e   :  { %v1697_v28 = vpop.f32.mrf.mxu0 }
0x218f   :  { %v1701_v29 = vadd.f32 %v1697_v28, %v4288_v0 }
0x2190   :  { %v3462_v14 = vpop.f32.mrf.mxu0 }
0x2191   :  { %3714 = vtanh.f32 %v1701_v29  ;;  %v3133_v32 = vmul.f32 -1.442695, %v1701_v29 }
0x2193   :  { %3716 = vpow2.f32 %v3133_v32 }
0x219e   :  { %v3715_v30 = vpop.eup %3714 }
0x219f   :  { %1714 = vrot.lane.b32.xlu1 %v3715_v30, %s3952_s1 }
0x21a0   :  { %v3717_v33 = vpop.eup %3716 }
0x21a1   :  { %v1705_v34 = vadd.f32 1.0, %v3717_v33 }
0x21a3   :  { %3718 = vrcp.f32 %v1705_v34 }
0x21b0   :  { %v3719_v35 = vpop.eup %3718 }
0x21b1   :  { %v1712_v39 = vmul.f32 %v3719_v35, %v1710_v38 }
0x2211   :  { %v1715_v36 = vpop.permute.xlu1 %1714 }
0x2212   :  { %v1717_v37 = vmul.f32 %v3719_v35, %v1715_v36 }
0x2214   :  { %1719 = vrot.lane.b32.xlu0 %v1717_v37, %s3953_s3 }
0x2286   :  { %v1720_v40 = vpop.permute.xlu0 %1719 }
0x2287   :  { %v1722_v41 = vadd.f32 %v1720_v40, %v1712_v39 }
0x2289   :  { %3720 = vtanh.f32 %v1722_v41 }
0x2296   :  { %v3721_v42 = vpop.eup %3720 }
0x2297   :  { %1725 = vrot.lane.b32.xlu1 %v3721_v42, %s3952_s1 }
0x2309   :  { %v1726_v12 = vpop.permute.xlu1 %1725 }
0x230a   :  { %v1728_v44 = vmul.f32 %v3719_v35, %v1726_v12 }
0x230c   :  { %1730 = vrot.lane.b32.xlu0 %v1728_v44, %s3953_s3  ;;  %v2072_v44 = vld [vmem:[#allocation11 + $0x10] sm:$0xff] }
0x237e   :  { %v1731_v45 = vpop.permute.xlu0 %1730 }
0x237f   :  { %1733 = vst.msk [vmem:[#allocation2 + $0x8] sm:$0x3] %vm325_vm2, %v1731_v45  ;;  %3472 = vmatmul.mubr.msk.f32.vlgmr.msra.gmra.mxu1 %vm222_vm3, %v1731_v45  ;;  %v4415_v45 = vld [vmem:[#allocation12 + $0x18] sm:$0xff] }
0x2380   :  { %3486 = vmatpush3.msra.mxu1 %v4241_v52  ;;  %3493 = vmatprep.mubr.msk.f32.mxu1 %vm3951_vm0, %v3950_v1 }
0x2381   :  { %3487 = vmatprep.subr.mxu1 %v3950_v1 }
0x2382   :  { %3488 = vmatpush3.msra.mxu1 %v4244_v53 }
0x2383   :  { %3489 = vmatprep.subr.mxu1 %v3950_v1 }
0x2384   :  { %3490 = vmatpush3.msra.mxu1 %v4247_v3 }
0x2385   :  { %3491 = vmatprep.subr.mxu1 %v3950_v1 }
0x2386   :  { %3492 = vmatpush3.msra.mxu1 %v4253_v55  ;;  %v1818_v55 = vrot.slane %v1722_v41, 6 }
0x2387   :  { %3507 = vmatprep.subr.mxu1 %v3950_v1 }
0x243f   :  { %v1802_v46 = vpop.f32.mrf.mxu1 }
0x2440   :  { %v1807_v47 = vrot.slane %v1802_v46, 6  ;;  %v4418_v46 = vld [vmem:[#allocation12 + $0x10] sm:$0xff] }
0x2441   :  { %v3473_v52 = vpop.f32.mrf.mxu1 }
0x2442   :  { %v1809_v48 = vadd.f32 %v1807_v47, %v4288_v0  ;;  %v2071_v47 = vld [vmem:[#allocation11 + $0x8] sm:$0xff] }
0x2443   :  { %v4421_v52 = vld [vmem:[#allocation12 + $0x8] sm:$0xff] }
0x2444   :  { %3722 = vtanh.f32 %v1809_v48  ;;  %v3135_v53 = vmul.f32 -1.442695, %v1809_v48  ;;  %v4427_v48 = vld [vmem:[#allocation12] sm:$0xff] }
0x2446   :  { %3724 = vpow2.f32 %v3135_v53 }
0x2451   :  { %v3723_v49 = vpop.eup %3722 }
0x2452   :  { %1822 = vrot.lane.b32.xlu1 %v3723_v49, %s3952_s1 }
0x2453   :  { %v3725_v31 = vpop.eup %3724 }
0x2454   :  { %v1813_v50 = vadd.f32 1.0, %v3725_v31 }
0x2456   :  { %3726 = vrcp.f32 %v1813_v50 }
0x2463   :  { %v3727_v3 = vpop.eup %3726 }
0x2464   :  { %v1820_v10 = vmul.f32 %v3727_v3, %v1818_v55 }
0x24c4   :  { %v1823_v51 = vpop.permute.xlu1 %1822 }
0x24c5   :  { %v1825_v54 = vmul.f32 %v3727_v3, %v1823_v51 }
0x24c7   :  { %1827 = vrot.lane.b32.xlu0 %v1825_v54, %s3953_s3 }
0x2539   :  { %v1828_v56 = vpop.permute.xlu0 %1827 }
0x253a   :  { %v1830_v5 = vadd.f32 %v1828_v56, %v1820_v10  ;;  %v3140_v56 = vld [vmem:[%s4592_s9] ss:$0 sm:$0xff] }
0x253c   :  { %3728 = vtanh.f32 %v1830_v5  ;;  %v1929_v18 = vrot.slane %v1830_v5, 6 }
0x2549   :  { %v3729_v57 = vpop.eup %3728 }
0x254a   :  { %1833 = vrot.lane.b32.xlu1 %v3729_v57, %s3952_s1 }
0x25bc   :  { %v1834_v58 = vpop.permute.xlu1 %1833 }
0x25bd   :  { %v4386_v8 = vmul.f32 %v3727_v3, %v1834_v58 }
0x25bf   :  { %v1842_v59 = vrot.slane %v4386_v8, 2 }
0x25c1   :  { %1843 = vrot.lane.b32.xlu0 %v1842_v59, %s3953_s3 }
0x2633   :  { %v1844_v60 = vpop.permute.xlu0 %1843 }
0x2634   :  { %3483 = vmatmul.mubr.msk.f32.vlgmr.msra.gmra.mxu0 %vm222_vm3, %v1844_v60 }
0x26f4   :  { %v1913_v61 = vpop.f32.mrf.mxu0 }
0x26f5   :  { %v1918_v62 = vrot.slane %v1913_v61, 4 }
0x26f6   :  { %v3484_v63 = vpop.f32.mrf.mxu0 }
0x26f7   :  { %v1920_v2 = vadd.f32 %v1918_v62, %v4288_v0 }
0x26f9   :  { %3730 = vtanh.f32 %v1920_v2  ;;  %v3137_v7 = vmul.f32 -1.442695, %v1920_v2 }
0x26fb   :  { %3732 = vpow2.f32 %v3137_v7 }
0x2706   :  { %v3731_v6 = vpop.eup %3730 }
0x2707   :  { %1933 = vrot.lane.b32.xlu1 %v3731_v6, %s3952_s1 }
0x2708   :  { %v3733_v11 = vpop.eup %3732 }
0x2709   :  { %v1924_v13 = vadd.f32 1.0, %v3733_v11 }
0x270b   :  { %3734 = vrcp.f32 %v1924_v13 }
0x2718   :  { %v3735_v15 = vpop.eup %3734 }
0x2719   :  { %v1931_v19 = vmul.f32 %v3735_v15, %v1929_v18 }
0x2779   :  { %v1934_v16 = vpop.permute.xlu1 %1933 }
0x277a   :  { %v1936_v17 = vmul.f32 %v3735_v15, %v1934_v16 }
0x277c   :  { %1938 = vrot.lane.b32.xlu0 %v1936_v17, %s3953_s3 }
0x27ee   :  { %v1939_v20 = vpop.permute.xlu0 %1938 }
0x27ef   :  { %v1941_v21 = vadd.f32 %v1939_v20, %v1931_v19 }
0x27f1   :  { %3736 = vtanh.f32 %v1941_v21 }
0x27fe   :  { %v3737_v22 = vpop.eup %3736 }
0x27ff   :  { %1944 = vrot.lane.b32.xlu1 %v3737_v22, %s3952_s1 }
0x2871   :  { %v1945_v23 = vpop.permute.xlu1 %1944 }
0x2872   :  { %v1947_v4 = vmul.f32 %v3735_v15, %v1945_v23 }
0x2874   :  { %v1953_v24 = vrot.slane %v1947_v4, 4 }
0x2876   :  { %1954 = vrot.lane.b32.xlu0 %v1953_v24, %s3953_s3 }
0x28e8   :  { %v1955_v26 = vpop.permute.xlu0 %1954 }
0x28e9   :  { %3494 = vmatmul.mubr.msk.f32.vlgmr.msra.gmra.mxu1 %vm222_vm3, %v1955_v26 }
0x28ea   :  { %3515 = vmatprep.mubr.msk.f32.mxu1 %vm3951_vm0, %v3950_v1  ;;  %3508 = vmatpush3.msra.mxu1 %v4415_v45 }
0x28eb   :  { %3509 = vmatprep.subr.mxu1 %v3950_v1 }
0x28ec   :  { %3510 = vmatpush3.msra.mxu1 %v4418_v46 }
0x28ed   :  { %3511 = vmatprep.subr.mxu1 %v3950_v1 }
0x28ee   :  { %3512 = vmatpush3.msra.mxu1 %v4421_v52 }
0x28ef   :  { %3513 = vmatprep.subr.mxu1 %v3950_v1 }
0x28f0   :  { %3514 = vmatpush3.msra.mxu1 %v4427_v48 }
0x28f1   :  { %3516 = vmatmul.mubr.f32.vlgmr.msra.gmra.mxu1 %v3950_v1  ;;  %3529 = vmatprep.subr.mxu1 %v3950_v1 }
0x28f2   :  { %3530 = vmatpush3.msra.mxu1 %v4415_v45  ;;  %3537 = vmatprep.mubr.msk.f32.mxu1 %vm3951_vm0, %v3950_v1 }
0x28f3   :  { %3531 = vmatprep.subr.mxu1 %v3950_v1 }
0x28f4   :  { %3532 = vmatpush3.msra.mxu1 %v4418_v46 }
0x28f5   :  { %3533 = vmatprep.subr.mxu1 %v3950_v1 }
0x28f6   :  { %3534 = vmatpush3.msra.mxu1 %v4421_v52 }
0x28f7   :  { %3535 = vmatprep.subr.mxu1 %v3950_v1 }
0x28f8   :  { %3536 = vmatpush3.msra.mxu1 %v4427_v48 }
0x28f9   :  { %3551 = vmatprep.subr.mxu1 %v3950_v1 }
0x29a9   :  { %v2024_v27 = vpop.f32.mrf.mxu1 }
0x29aa   :  { %v2029_v28 = vrot.slane %v2024_v27, 2 }
0x29ab   :  { %v3495_v29 = vpop.f32.mrf.mxu1 }
0x29ac   :  { %v2031_v14 = vadd.f32 %v2029_v28, %v4288_v0  ;;  %v2040_v0 = vrot.slane %v1941_v21, 6 }
0x29ae   :  { %3738 = vtanh.f32 %v2031_v14  ;;  %v3139_v32 = vmul.f32 -1.442695, %v2031_v14 }
0x29b0   :  { %3740 = vpow2.f32 %v3139_v32 }
0x29b1   :  { %v2228_v55 = vpop.f32.mrf.mxu1 }
0x29b3   :  { %v3517_v10 = vpop.f32.mrf.mxu1 }
0x29bb   :  { %v3739_v30 = vpop.eup %3738 }
0x29bc   :  { %2044 = vrot.lane.b32.xlu1 %v3739_v30, %s3952_s1 }
0x29bd   :  { %v3741_v33 = vpop.eup %3740 }
0x29be   :  { %v2035_v34 = vadd.f32 1.0, %v3741_v33 }
0x29c0   :  { %3742 = vrcp.f32 %v2035_v34 }
0x29cd   :  { %v3743_v35 = vpop.eup %3742 }
0x29ce   :  { %v2042_v38 = vmul.f32 %v3743_v35, %v2040_v0 }
0x2a2e   :  { %v2045_v36 = vpop.permute.xlu1 %2044 }
0x2a2f   :  { %v2047_v37 = vmul.f32 %v3743_v35, %v2045_v36 }
0x2a31   :  { %2049 = vrot.lane.b32.xlu0 %v2047_v37, %s3953_s3 }
0x2a35   :  { %1400 = vrot.lane.b32.xlu0 %v4313_v43, %s3953_s3 }
0x2a39   :  { %1622 = vrot.lane.b32.xlu0 %v4351_v25, %s3953_s3  ;;  %v2073_v25 = vld [vmem:[#allocation11 + $0x18] sm:$0xff] }
0x2a3a   :  { %3496 = vmatprep.subr.mxu0 %v2073_v25 }
0x2a3b   :  { %3497 = vmatpush3.msra.mxu0 %v2073_v25 }
0x2a3c   :  { %3498 = vmatprep.subr.mxu0 %v2072_v44 }
0x2a3d   :  { %1949 = vrot.lane.b32.xlu0 %v1947_v4, %s3953_s3  ;;  %3499 = vmatpush3.msra.mxu0 %v2072_v44 }
0x2a3e   :  { %3500 = vmatprep.subr.mxu0 %v2071_v47 }
0x2a3f   :  { %3501 = vmatpush3.msra.mxu0 %v2071_v47 }
0x2aa3   :  { %v2050_v39 = vpop.permute.xlu0 %2049 }
0x2aa4   :  { %v2052_v40 = vadd.f32 %v2050_v39, %v2042_v38 }
0x2aa6   :  { %3744 = vtanh.f32 %v2052_v40 }
0x2aa7   :  { %v1401_v41 = vpop.permute.xlu0 %1400 }
0x2aa8   :  { %1403 = vst.msk [vmem:[#allocation2] sm:$0xc] %vm434_vm4, %v1401_v41 }
0x2aab   :  { %v1623_v42 = vpop.permute.xlu0 %1622 }
0x2aac   :  { %1625 = vst.msk [vmem:[#allocation2] sm:$0xc0] %vm658_vm5, %v1623_v42 }
0x2aaf   :  { %v1950_v12 = vpop.permute.xlu0 %1949 }
0x2ab0   :  { %1952 = vst.msk [vmem:[#allocation2 + $0x8] sm:$0x30] %vm546_vm6, %v1950_v12 }
0x2ab3   :  { %v3745_v43 = vpop.eup %3744 }
0x2ab4   :  { %2055 = vrot.lane.b32.xlu1 %v3745_v43, %s3952_s1 }
0x2ab8   :  { %1511 = vrot.lane.b32.xlu1 %v4332_v9, %s3953_s3  ;;  %v2070_v9 = vld [vmem:[#allocation11] sm:$0xff] }
0x2ab9   :  { %3502 = vmatprep.subr.mxu0 %v2070_v9 }
0x2aba   :  { %3503 = vmatpush3.msra.mxu0 %v2070_v9 }
0x2abb   :  { %3518 = vmatprep.subr.mxu0 %v3950_v1 }
0x2abc   :  { %1838 = vrot.lane.b32.xlu1 %v4386_v8, %s3953_s3 }
0x2b26   :  { %v2056_v49 = vpop.permute.xlu1 %2055 }
0x2b27   :  { %v2058_v53 = vmul.f32 %v3743_v35, %v2056_v49 }
0x2b29   :  { %2060 = vrot.lane.b32.xlu1 %v2058_v53, %s3953_s3 }
0x2b2a   :  { %v1512_v31 = vpop.permute.xlu1 %1511 }
0x2b2b   :  { %1514 = vst.msk [vmem:[#allocation2] sm:$0x30] %vm546_vm6, %v1512_v31 }
0x2b2e   :  { %v1839_v50 = vpop.permute.xlu1 %1838 }
0x2b2f   :  { %1841 = vst.msk [vmem:[#allocation2 + $0x8] sm:$0xc] %vm434_vm4, %v1839_v50 }
0x2b32   :  { %v2064_v3 = vld [vmem:[#allocation2] sm:$0xff] }
0x2b33   :  { %3504 = vmatprep.mubr.msk.f32.mxu0 %vm222_vm3, %v2064_v3 }
0x2b9b   :  { %v2061_v51 = vpop.permute.xlu1 %2060 }
0x2b9c   :  { %2063 = vst.msk [vmem:[#allocation2 + $0x8] sm:$0xc0] %vm658_vm5, %v2061_v51 }
0x2ba3   :  { %v2065_v54 = vld [vmem:[#allocation2 + $0x8] sm:$0xff] }
0x2ba4   :  { %3505 = vmatmul.mubr.msk.f32.vlgmr.msra.gmra.mxu0 %vm222_vm3, %v2065_v54 }
0x2ba5   :  { %3519 = vmatpush3.msra.mxu0 %v4415_v45  ;;  %3526 = vmatprep.mubr.msk.f32.mxu0 %vm3951_vm0, %v3950_v1 }
0x2ba6   :  { %3520 = vmatprep.subr.mxu0 %v3950_v1 }
0x2ba7   :  { %3521 = vmatpush3.msra.mxu0 %v4418_v46 }
0x2ba8   :  { %3522 = vmatprep.subr.mxu0 %v3950_v1 }
0x2ba9   :  { %3523 = vmatpush3.msra.mxu0 %v4421_v52 }
0x2baa   :  { %3524 = vmatprep.subr.mxu0 %v3950_v1 }
0x2bab   :  { %3525 = vmatpush3.msra.mxu0 %v4427_v48 }
0x2bac   :  { %3540 = vmatprep.subr.mxu0 %v3950_v1 }
0x2c64   :  { %v3506_v5 = vpop.f32.mrf.mxu0 }
0x2c65   :  { %v4462_v57 = vadd.f32 %v3506_v5, %v3140_v56 }
0x2c66   :  { %v2153_v58 = vpop.f32.mrf.mxu0 }
0x2c67   :  { %v4464_v8 = vadd.f32 %v3140_v56, %v2153_v58 }
0x2c69   :  { %v2232_v59 = vadd.f32 %v2228_v55, %v4464_v8 }
0x2c6b   :  { %3746 = vtanh.f32 %v2232_v59  ;;  %v3143_v61 = vmul.f32 -1.442695, %v2232_v59 }
0x2c6d   :  { %3748 = vpow2.f32 %v3143_v61 }
0x2c78   :  { %v3747_v60 = vpop.eup %3746 }
0x2c79   :  { %2242 = vrot.lane.b32.xlu0 %v3747_v60, %s3952_s1 }
0x2c7a   :  { %v3749_v62 = vpop.eup %3748 }
0x2c7b   :  { %v2236_v63 = vadd.f32 1.0, %v3749_v62 }
0x2c7d   :  { %3750 = vrcp.f32 %v2236_v63 }
0x2c8a   :  { %v3751_v2 = vpop.eup %3750 }
0x2c8b   :  { %v2240_v11 = vmul.f32 0.0, %v3751_v2 }
0x2ceb   :  { %v2243_v6 = vpop.permute.xlu0 %2242 }
0x2cec   :  { %v2245_v7 = vmul.f32 %v3751_v2, %v2243_v6 }
0x2cee   :  { %2247 = vrot.lane.b32.xlu1 %v2245_v7, %s3953_s3 }
0x2d60   :  { %v2248_v13 = vpop.permute.xlu1 %2247 }
0x2d61   :  { %v2250_v15 = vadd.f32 %v2248_v13, %v2240_v11 }
0x2d63   :  { %3752 = vtanh.f32 %v2250_v15  ;;  %v2344_v30 = vrot.slane %v2250_v15, 6 }
0x2d70   :  { %v3753_v16 = vpop.eup %3752 }
0x2d71   :  { %2253 = vrot.lane.b32.xlu0 %v3753_v16, %s3952_s1 }
0x2de3   :  { %v2254_v17 = vpop.permute.xlu0 %2253 }
0x2de4   :  { %v2256_v18 = vmul.f32 %v3751_v2, %v2254_v17 }
0x2de6   :  { %2258 = vrot.lane.b32.xlu1 %v2256_v18, %s3953_s3 }
0x2e58   :  { %v2259_v19 = vpop.permute.xlu1 %2258 }
0x2e59   :  { %3527 = vmatmul.mubr.msk.f32.vlgmr.msra.gmra.mxu0 %vm222_vm3, %v2259_v19 }
0x2e5a   :  { %3541 = vmatpush3.msra.mxu0 %v4415_v45  ;;  %3548 = vmatprep.mubr.msk.f32.mxu0 %vm3951_vm0, %v3950_v1 }
0x2e5b   :  { %3542 = vmatprep.subr.mxu0 %v3950_v1 }
0x2e5c   :  { %3543 = vmatpush3.msra.mxu0 %v4418_v46 }
0x2e5d   :  { %3544 = vmatprep.subr.mxu0 %v3950_v1 }
0x2e5e   :  { %3545 = vmatpush3.msra.mxu0 %v4421_v52 }
0x2e5f   :  { %3546 = vmatprep.subr.mxu0 %v3950_v1 }
0x2e60   :  { %3547 = vmatpush3.msra.mxu0 %v4427_v48 }
0x2e61   :  { %3562 = vmatprep.subr.mxu0 %v3950_v1 }
0x2f19   :  { %v2328_v20 = vpop.f32.mrf.mxu0 }
0x2f1a   :  { %v2333_v21 = vrot.slane %v2328_v20, 6 }
0x2f1b   :  { %v3528_v22 = vpop.f32.mrf.mxu0 }
0x2f1c   :  { %v2335_v23 = vadd.f32 %v2333_v21, %v4464_v8 }
0x2f1e   :  { %3754 = vtanh.f32 %v2335_v23  ;;  %v3145_v24 = vmul.f32 -1.442695, %v2335_v23 }
0x2f20   :  { %3756 = vpow2.f32 %v3145_v24 }
0x2f2b   :  { %v3755_v4 = vpop.eup %3754 }
0x2f2c   :  { %2348 = vrot.lane.b32.xlu0 %v3755_v4, %s3952_s1 }
0x2f2d   :  { %v3757_v26 = vpop.eup %3756 }
0x2f2e   :  { %v2339_v27 = vadd.f32 1.0, %v3757_v26 }
0x2f30   :  { %3758 = vrcp.f32 %v2339_v27 }
0x2f3d   :  { %v3759_v28 = vpop.eup %3758 }
0x2f3e   :  { %v2346_v32 = vmul.f32 %v3759_v28, %v2344_v30 }
0x2f9e   :  { %v2349_v29 = vpop.permute.xlu0 %2348 }
0x2f9f   :  { %v2351_v14 = vmul.f32 %v3759_v28, %v2349_v29 }
0x2fa1   :  { %2353 = vrot.lane.b32.xlu1 %v2351_v14, %s3953_s3 }
0x3013   :  { %v2354_v33 = vpop.permute.xlu1 %2353 }
0x3014   :  { %v2356_v34 = vadd.f32 %v2354_v33, %v2346_v32 }
0x3016   :  { %3760 = vtanh.f32 %v2356_v34  ;;  %v2451_v53 = vrot.slane %v2356_v34, 6 }
0x3023   :  { %v3761_v35 = vpop.eup %3760 }
0x3024   :  { %2359 = vrot.lane.b32.xlu0 %v3761_v35, %s3952_s1 }
0x3096   :  { %v2360_v36 = vpop.permute.xlu0 %2359 }
0x3097   :  { %v2362_v37 = vmul.f32 %v3759_v28, %v2360_v36 }
0x3099   :  { %v2364_v0 = vrot.slane %v2362_v37, 2 }
0x309b   :  { %2365 = vrot.lane.b32.xlu1 %v2364_v0, %s3953_s3 }
0x310d   :  { %v2366_v38 = vpop.permute.xlu1 %2365 }
0x310e   :  { %3538 = vmatmul.mubr.msk.f32.vlgmr.msra.gmra.mxu1 %vm222_vm3, %v2366_v38 }
0x310f   :  { %3552 = vmatpush3.msra.mxu1 %v4415_v45  ;;  %3559 = vmatprep.mubr.msk.f32.mxu1 %vm3951_vm0, %v3950_v1 }
0x3110   :  { %3553 = vmatprep.subr.mxu1 %v3950_v1 }
0x3111   :  { %3554 = vmatpush3.msra.mxu1 %v4418_v46 }
0x3112   :  { %3555 = vmatprep.subr.mxu1 %v3950_v1 }
0x3113   :  { %3556 = vmatpush3.msra.mxu1 %v4421_v52 }
0x3114   :  { %3557 = vmatprep.subr.mxu1 %v3950_v1 }
0x3115   :  { %3558 = vmatpush3.msra.mxu1 %v4427_v48 }
0x3116   :  { %3573 = vmatprep.subr.mxu1 %v3950_v1 }
0x31ce   :  { %v2435_v39 = vpop.f32.mrf.mxu1 }
0x31cf   :  { %v2440_v40 = vrot.slane %v2435_v39, 4 }
0x31d0   :  { %v3539_v41 = vpop.f32.mrf.mxu1 }
0x31d1   :  { %v2442_v42 = vadd.f32 %v2440_v40, %v4464_v8 }
0x31d3   :  { %3762 = vtanh.f32 %v2442_v42  ;;  %v3147_v43 = vmul.f32 -1.442695, %v2442_v42 }
0x31d5   :  { %3764 = vpow2.f32 %v3147_v43 }
0x31e0   :  { %v3763_v12 = vpop.eup %3762 }
0x31e1   :  { %2455 = vrot.lane.b32.xlu0 %v3763_v12, %s3952_s1 }
0x31e2   :  { %v3765_v25 = vpop.eup %3764 }
0x31e3   :  { %v2446_v44 = vadd.f32 1.0, %v3765_v25 }
0x31e5   :  { %3766 = vrcp.f32 %v2446_v44 }
0x31f2   :  { %v3767_v47 = vpop.eup %3766 }
0x31f3   :  { %v2453_v31 = vmul.f32 %v3767_v47, %v2451_v53 }
0x3253   :  { %v2456_v9 = vpop.permute.xlu0 %2455 }
0x3254   :  { %v2458_v49 = vmul.f32 %v3767_v47, %v2456_v9 }
0x3256   :  { %2460 = vrot.lane.b32.xlu1 %v2458_v49, %s3953_s3 }
0x32c8   :  { %v2461_v50 = vpop.permute.xlu1 %2460 }
0x32c9   :  { %v2463_v3 = vadd.f32 %v2461_v50, %v2453_v31 }
0x32cb   :  { %3768 = vtanh.f32 %v2463_v3  ;;  %v2558_v13 = vrot.slane %v2463_v3, 6 }
0x32d8   :  { %v3769_v51 = vpop.eup %3768 }
0x32d9   :  { %2466 = vrot.lane.b32.xlu0 %v3769_v51, %s3952_s1 }
0x334b   :  { %v2467_v54 = vpop.permute.xlu0 %2466 }
0x334c   :  { %v2469_v55 = vmul.f32 %v3767_v47, %v2467_v54 }
0x334e   :  { %v2471_v10 = vrot.slane %v2469_v55, 4 }
0x3350   :  { %2472 = vrot.lane.b32.xlu1 %v2471_v10, %s3953_s3 }
0x33c2   :  { %v2473_v56 = vpop.permute.xlu1 %2472 }
0x33c3   :  { %3549 = vmatmul.mubr.msk.f32.vlgmr.msra.gmra.mxu0 %vm222_vm3, %v2473_v56 }
0x33c4   :  { %3563 = vmatpush3.msra.mxu0 %v4415_v45  ;;  %3570 = vmatprep.mubr.msk.f32.mxu0 %vm3951_vm0, %v3950_v1 }
0x33c5   :  { %3564 = vmatprep.subr.mxu0 %v3950_v1 }
0x33c6   :  { %3565 = vmatpush3.msra.mxu0 %v4418_v46 }
0x33c7   :  { %3566 = vmatprep.subr.mxu0 %v3950_v1 }
0x33c8   :  { %3567 = vmatpush3.msra.mxu0 %v4421_v52 }
0x33c9   :  { %3568 = vmatprep.subr.mxu0 %v3950_v1 }
0x33ca   :  { %3569 = vmatpush3.msra.mxu0 %v4427_v48 }
0x33cb   :  { %3584 = vmatprep.subr.mxu0 %v3950_v1 }
0x3483   :  { %v2542_v5 = vpop.f32.mrf.mxu0 }
0x3484   :  { %v2547_v58 = vrot.slane %v2542_v5, 2 }
0x3485   :  { %v3550_v59 = vpop.f32.mrf.mxu0 }
0x3486   :  { %v2549_v60 = vadd.f32 %v2547_v58, %v4464_v8 }
0x3488   :  { %3770 = vtanh.f32 %v2549_v60  ;;  %v3149_v62 = vmul.f32 -1.442695, %v2549_v60 }
0x348a   :  { %3772 = vpow2.f32 %v3149_v62 }
0x3495   :  { %v3771_v61 = vpop.eup %3770 }
0x3496   :  { %2562 = vrot.lane.b32.xlu0 %v3771_v61, %s3952_s1 }
0x3497   :  { %v3773_v63 = vpop.eup %3772 }
0x3498   :  { %v2553_v2 = vadd.f32 1.0, %v3773_v63 }
0x349a   :  { %3774 = vrcp.f32 %v2553_v2 }
0x34a7   :  { %v3775_v6 = vpop.eup %3774 }
0x34a8   :  { %v2560_v15 = vmul.f32 %v3775_v6, %v2558_v13 }
0x3508   :  { %v2563_v7 = vpop.permute.xlu0 %2562 }
0x3509   :  { %v2565_v11 = vmul.f32 %v3775_v6, %v2563_v7 }
0x350b   :  { %2567 = vrot.lane.b32.xlu1 %v2565_v11, %s3953_s3 }
0x357d   :  { %v2568_v16 = vpop.permute.xlu1 %2567 }
0x357e   :  { %v2570_v17 = vadd.f32 %v2568_v16, %v2560_v15 }
0x3580   :  { %3776 = vtanh.f32 %v2570_v17  ;;  %v2662_v32 = vrot.slane %v2570_v17, 6 }
0x358d   :  { %v3777_v8 = vpop.eup %3776 }
0x358e   :  { %2573 = vrot.lane.b32.xlu0 %v3777_v8, %s3952_s1 }
0x3600   :  { %v2574_v18 = vpop.permute.xlu0 %2573 }
0x3601   :  { %v2576_v19 = vmul.f32 %v3775_v6, %v2574_v18 }
0x3603   :  { %v2578_v20 = vrot.slane %v2576_v19, 6 }
0x3605   :  { %2579 = vrot.lane.b32.xlu1 %v2578_v20, %s3953_s3 }
0x3677   :  { %v2580_v21 = vpop.permute.xlu1 %2579 }
0x3678   :  { %3560 = vmatmul.mubr.msk.f32.vlgmr.msra.gmra.mxu1 %vm222_vm3, %v2580_v21 }
0x3679   :  { %3574 = vmatpush3.msra.mxu1 %v4415_v45  ;;  %3581 = vmatprep.mubr.msk.f32.mxu1 %vm3951_vm0, %v3950_v1 }
0x367a   :  { %3575 = vmatprep.subr.mxu1 %v3950_v1 }
0x367b   :  { %3576 = vmatpush3.msra.mxu1 %v4418_v46 }
0x367c   :  { %3577 = vmatprep.subr.mxu1 %v3950_v1 }
0x367d   :  { %3578 = vmatpush3.msra.mxu1 %v4421_v52 }
0x367e   :  { %3579 = vmatprep.subr.mxu1 %v3950_v1 }
0x367f   :  { %3580 = vmatpush3.msra.mxu1 %v4427_v48 }
0x3680   :  { %3595 = vmatprep.subr.mxu1 %v3950_v1 }
0x3738   :  { %v2649_v22 = vpop.f32.mrf.mxu1 }
0x3739   :  { %v2653_v23 = vadd.f32 %v2649_v22, %v4462_v57 }
0x373a   :  { %v3561_v4 = vpop.f32.mrf.mxu1 }
0x373b   :  { %3778 = vtanh.f32 %v2653_v23  ;;  %v3151_v26 = vmul.f32 -1.442695, %v2653_v23 }
0x373d   :  { %3780 = vpow2.f32 %v3151_v26 }
0x3748   :  { %v3779_v24 = vpop.eup %3778 }
0x3749   :  { %2666 = vrot.lane.b32.xlu0 %v3779_v24, %s3952_s1 }
0x374a   :  { %v3781_v27 = vpop.eup %3780 }
0x374b   :  { %v2657_v28 = vadd.f32 1.0, %v3781_v27 }
0x374d   :  { %3782 = vrcp.f32 %v2657_v28 }
0x375a   :  { %v3783_v29 = vpop.eup %3782 }
0x375b   :  { %v2664_v33 = vmul.f32 %v3783_v29, %v2662_v32 }
0x37bb   :  { %v2667_v14 = vpop.permute.xlu0 %2666 }
0x37bc   :  { %v2669_v30 = vmul.f32 %v3783_v29, %v2667_v14 }
0x37be   :  { %2671 = vrot.lane.b32.xlu1 %v2669_v30, %s3953_s3 }
0x3830   :  { %v2672_v34 = vpop.permute.xlu1 %2671 }
0x3831   :  { %v2674_v35 = vadd.f32 %v2672_v34, %v2664_v33  ;;  %v3003_v33 = vld [vmem:[%s4593_s10 + $0x10] sm:$0xff]  ;;  %v3002_v34 = vld [vmem:[%s4593_s10 + $0x8] sm:$0xff] }
0x3833   :  { %3784 = vtanh.f32 %v2674_v35 }
0x3840   :  { %v3785_v36 = vpop.eup %3784 }
0x3841   :  { %2677 = vrot.lane.b32.xlu0 %v3785_v36, %s3952_s1 }
0x38b3   :  { %v2678_v37 = vpop.permute.xlu0 %2677 }
0x38b4   :  { %v2680_v0 = vmul.f32 %v3783_v29, %v2678_v37 }
0x38b6   :  { %2682 = vrot.lane.b32.xlu1 %v2680_v0, %s3953_s3 }
0x3928   :  { %v2683_v38 = vpop.permute.xlu1 %2682 }
0x3929   :  { %3571 = vmatmul.mubr.msk.f32.vlgmr.msra.gmra.mxu0 %vm222_vm3, %v2683_v38 }
0x392a   :  { %3585 = vmatpush3.msra.mxu0 %v4415_v45  ;;  %3592 = vmatprep.mubr.msk.f32.mxu0 %vm3951_vm0, %v3950_v1 }
0x392b   :  { %3586 = vmatprep.subr.mxu0 %v3950_v1 }
0x392c   :  { %3587 = vmatpush3.msra.mxu0 %v4418_v46 }
0x392d   :  { %3588 = vmatprep.subr.mxu0 %v3950_v1 }
0x392e   :  { %3589 = vmatpush3.msra.mxu0 %v4421_v52 }
0x392f   :  { %3590 = vmatprep.subr.mxu0 %v3950_v1 }
0x3930   :  { %3591 = vmatpush3.msra.mxu0 %v4427_v48  ;;  %v2768_v48 = vrot.slane %v2674_v35, 6  ;;  %v3001_v35 = vld [vmem:[%s4593_s10] sm:$0xff] }
0x39e9   :  { %v2752_v39 = vpop.f32.mrf.mxu0 }
0x39ea   :  { %v2757_v40 = vrot.slane %v2752_v39, 6 }
0x39eb   :  { %v3572_v41 = vpop.f32.mrf.mxu0 }
0x39ec   :  { %v2759_v45 = vadd.f32 %v2757_v40, %v4462_v57  ;;  %v3158_v40 = vld [vmem:[#allocation3] ss:$0 sm:$0xff] }
0x39ee   :  { %3786 = vtanh.f32 %v2759_v45  ;;  %v3153_v12 = vmul.f32 -1.442695, %v2759_v45 }
0x39f0   :  { %3788 = vpow2.f32 %v3153_v12 }
0x39fb   :  { %v3787_v42 = vpop.eup %3786 }
0x39fc   :  { %2772 = vrot.lane.b32.xlu0 %v3787_v42, %s3952_s1 }
0x39fd   :  { %v3789_v46 = vpop.eup %3788 }
0x39fe   :  { %v2763_v43 = vadd.f32 1.0, %v3789_v46 }
0x3a00   :  { %3790 = vrcp.f32 %v2763_v43 }
0x3a0d   :  { %v3791_v25 = vpop.eup %3790 }
0x3a0e   :  { %v2770_v47 = vmul.f32 %v3791_v25, %v2768_v48 }
0x3a6e   :  { %v2773_v52 = vpop.permute.xlu0 %2772 }
0x3a6f   :  { %v2775_v44 = vmul.f32 %v3791_v25, %v2773_v52 }
0x3a71   :  { %2777 = vrot.lane.b32.xlu1 %v2775_v44, %s3953_s3 }
0x3ae3   :  { %v2778_v9 = vpop.permute.xlu1 %2777 }
0x3ae4   :  { %v2780_v49 = vadd.f32 %v2778_v9, %v2770_v47 }
0x3ae6   :  { %3792 = vtanh.f32 %v2780_v49  ;;  %v2875_v2 = vrot.slane %v2780_v49, 6 }
0x3af3   :  { %v3793_v53 = vpop.eup %3792 }
0x3af4   :  { %2783 = vrot.lane.b32.xlu0 %v3793_v53, %s3952_s1 }
0x3b66   :  { %v2784_v31 = vpop.permute.xlu0 %2783 }
0x3b67   :  { %v2786_v50 = vmul.f32 %v3791_v25, %v2784_v31 }
0x3b69   :  { %v2788_v3 = vrot.slane %v2786_v50, 2 }
0x3b6b   :  { %2789 = vrot.lane.b32.xlu1 %v2788_v3, %s3953_s3 }
0x3bdd   :  { %v2790_v51 = vpop.permute.xlu1 %2789 }
0x3bde   :  { %3582 = vmatmul.mubr.msk.f32.vlgmr.msra.gmra.mxu1 %vm222_vm3, %v2790_v51 }
0x3bdf   :  { %3603 = vmatprep.mubr.msk.f32.mxu1 %vm3951_vm0, %v3950_v1 }
0x3c9e   :  { %v2859_v54 = vpop.f32.mrf.mxu1 }
0x3c9f   :  { %v2864_v55 = vrot.slane %v2859_v54, 4 }
0x3ca0   :  { %v3583_v10 = vpop.f32.mrf.mxu1 }
0x3ca1   :  { %v2866_v56 = vadd.f32 %v2864_v55, %v4462_v57 }
0x3ca3   :  { %3794 = vtanh.f32 %v2866_v56  ;;  %v3155_v58 = vmul.f32 -1.442695, %v2866_v56 }
0x3ca5   :  { %3796 = vpow2.f32 %v3155_v58 }
0x3cb0   :  { %v3795_v5 = vpop.eup %3794 }
0x3cb1   :  { %2879 = vrot.lane.b32.xlu0 %v3795_v5, %s3952_s1 }
0x3cb2   :  { %v3797_v59 = vpop.eup %3796 }
0x3cb3   :  { %v2870_v60 = vadd.f32 1.0, %v3797_v59 }
0x3cb5   :  { %3798 = vrcp.f32 %v2870_v60 }
0x3cc2   :  { %v3799_v61 = vpop.eup %3798 }
0x3cc3   :  { %v2877_v6 = vmul.f32 %v3799_v61, %v2875_v2 }
0x3d23   :  { %v2880_v62 = vpop.permute.xlu0 %2879 }
0x3d24   :  { %v2882_v63 = vmul.f32 %v3799_v61, %v2880_v62 }
0x3d26   :  { %2884 = vrot.lane.b32.xlu1 %v2882_v63, %s3953_s3 }
0x3d98   :  { %v2885_v7 = vpop.permute.xlu1 %2884 }
0x3d99   :  { %v2887_v11 = vadd.f32 %v2885_v7, %v2877_v6 }
0x3d9b   :  { %3800 = vtanh.f32 %v2887_v11  ;;  %v2982_v29 = vrot.slane %v2887_v11, 6 }
0x3da8   :  { %v3801_v13 = vpop.eup %3800 }
0x3da9   :  { %2890 = vrot.lane.b32.xlu0 %v3801_v13, %s3952_s1 }
0x3e1b   :  { %v2891_v15 = vpop.permute.xlu0 %2890 }
0x3e1c   :  { %v2893_v16 = vmul.f32 %v3799_v61, %v2891_v15 }
0x3e1e   :  { %v2895_v17 = vrot.slane %v2893_v16, 4 }
0x3e20   :  { %2896 = vrot.lane.b32.xlu1 %v2895_v17, %s3953_s3 }
0x3e92   :  { %v2897_v8 = vpop.permute.xlu1 %2896 }
0x3e93   :  { %3593 = vmatmul.mubr.msk.f32.vlgmr.msra.gmra.mxu0 %vm222_vm3, %v2897_v8 }
0x3f53   :  { %v2966_v18 = vpop.f32.mrf.mxu0 }
0x3f54   :  { %v2971_v19 = vrot.slane %v2966_v18, 2 }
0x3f55   :  { %v3594_v20 = vpop.f32.mrf.mxu0 }
0x3f56   :  { %v2973_v21 = vadd.f32 %v2971_v19, %v4462_v57  ;;  %v3004_v57 = vld [vmem:[%s4593_s10 + $0x18] sm:$0xff] }
0x3f57   :  { %3596 = vmatpush3.msra.mxu1 %v3004_v57 }
0x3f58   :  { %3802 = vtanh.f32 %v2973_v21  ;;  %v3157_v23 = vmul.f32 -1.442695, %v2973_v21  ;;  %3597 = vmatprep.subr.mxu1 %v3950_v1 }
0x3f59   :  { %3598 = vmatpush3.msra.mxu1 %v3003_v33 }
0x3f5a   :  { %3804 = vpow2.f32 %v3157_v23  ;;  %3599 = vmatprep.subr.mxu1 %v3950_v1 }
0x3f5b   :  { %3600 = vmatpush3.msra.mxu1 %v3002_v34 }
0x3f5c   :  { %3601 = vmatprep.subr.mxu1 %v3950_v1 }
0x3f5d   :  { %3602 = vmatpush3.msra.mxu1 %v3001_v35 }
0x3f65   :  { %v3803_v22 = vpop.eup %3802 }
0x3f66   :  { %2986 = vrot.lane.b32.xlu0 %v3803_v22, %s3952_s1 }
0x3f67   :  { %v3805_v4 = vpop.eup %3804 }
0x3f68   :  { %v2977_v24 = vadd.f32 1.0, %v3805_v4 }
0x3f6a   :  { %3806 = vrcp.f32 %v2977_v24 }
0x3f77   :  { %v3807_v26 = vpop.eup %3806 }
0x3f78   :  { %v2984_v14 = vmul.f32 %v3807_v26, %v2982_v29 }
0x3fd8   :  { %v2987_v27 = vpop.permute.xlu0 %2986 }
0x3fd9   :  { %v2989_v28 = vmul.f32 %v3807_v26, %v2987_v27 }
0x3fdb   :  { %2991 = vrot.lane.b32.xlu1 %v2989_v28, %s3953_s3 }
0x404d   :  { %v2992_v30 = vpop.permute.xlu1 %2991 }
0x404e   :  { %v2994_v32 = vadd.f32 %v2992_v30, %v2984_v14 }
0x4050   :  { %3808 = vtanh.f32 %v2994_v32 }
0x405d   :  { %v3809_v36 = vpop.eup %3808 }
0x405e   :  { %2997 = vrot.lane.b32.xlu0 %v3809_v36, %s3952_s1 }
0x40d0   :  { %v2998_v37 = vpop.permute.xlu0 %2997 }
0x40d1   :  { %v3000_v0 = vmul.f32 %v3807_v26, %v2998_v37 }
0x40d3   :  { %v3013_v38 = vrot.slane %v3000_v0, 6 }
0x40d5   :  { %3014 = vrot.lane.b32.xlu1 %v3013_v38, %s3953_s3 }
0x4147   :  { %v3015_v39 = vpop.permute.xlu1 %3014 }
0x4148   :  { %3604 = vmatmul.mubr.msk.f32.vlgmr.msra.gmra.mxu1 %vm222_vm3, %v3015_v39 }
0x4208   :  { %v3084_v41 = vpop.f32.mrf.mxu1 }
0x4209   :  { %v3085_v45 = vadd.f32 %v3158_v40, %v3084_v41 }
0x420a   :  { %v3605_v42 = vpop.f32.mrf.mxu1 }
0x420b   :  { %v3160_v12 = vmul.f32 -1.442695, %v3085_v45 }
0x420d   :  { %3810 = vpow2.f32 %v3160_v12 }
0x421a   :  { %v3811_v46 = vpop.eup %3810 }
0x421b   :  { %v3091_v1 = vadd.f32 1.0, %v3811_v46 }
0x421d   :  { %3812 = vrcp.f32 %v3091_v1 }
0x422a   :  { %v3813_v43 = vpop.eup %3812 }
0x422b   :  { %3095 = vst.msk [vmem:[%s4595_s12] sm:$0x3] %vm3094_vm7, %v3813_v43 }
0x422c   :  { %3100 = vsyncpa [#allocation5], 1 }
0x422d   :  { %3101 = vsyncpa [#allocation7], 1 }
0x422e   :  { %3102 = vsyncpa [#allocation10], 1 }
0x422f   :  { %3103 = vsyncpa [#allocation13], 1 }

</bundles_post_ra>
